<compile_context>
chip_gen: v7x
topology: tpu7x:2x2x1
jax: 0.10.0
libtpu: 0.0.40
codegen_flags: <defaults>
</compile_context>

<pallas_src>
import math
import numpy as np
import jax
import jax.numpy as jnp
from jax import lax
from jax.experimental import pallas as pl
from jax.experimental.pallas import tpu as pltpu


def _round_up(x, m):
    return (x + m - 1) // m * m


def _pick_batch_block(n, max_b=4):
    """Images per grid step.  Amortizes per-step pipeline overhead while
    preferring an even grid length so v7x's two TensorCores stay balanced."""
    divs = [b for b in range(1, min(n, max_b) + 1) if n % b == 0]
    even = [b for b in divs if (n // b) % 2 == 0]
    return max(even) if even else max(divs)


def _erf(x):
    """erf via Abramowitz & Stegun 7.1.26 (|abs err| < 1.6e-7).

    Only abs / mul / exp / where plus an EUP reciprocal -> always lowers in
    Mosaic; the divide shares the (otherwise idle) EUP slot with the exp.
    """
    a1, a2, a3, a4, a5 = 0.254829592, -0.284496736, 1.421413741, -1.453152027, 1.061405429
    pc = 0.3275911
    ax = jnp.abs(x)
    t = pl.reciprocal(1.0 + pc * ax, approx=True)
    poly = ((((a5 * t + a4) * t + a3) * t + a2) * t + a1) * t
    y = 1.0 - poly * jnp.exp(-ax * ax)
    return jnp.where(x < 0, -y, y)


def _gelu_exact(x):
    return 0.5 * x * (1.0 + _erf(x * (1.0 / math.sqrt(2.0))))


# ------------------------------ fused kernels --------------------------------

def _make_folded_kernel(Wp, NA, NB, B, mxu_dtype):
    """linear=False path: fc1 + zero-pad + ConvTranspose folded into ONE 3x3 conv
    on the (wrapper-pre-padded) input.  No scratch, no memset, no fc1 matmul."""
    taps = [dy * Wp + dx for dy in range(3) for dx in range(3)]

    def kernel(xp_ref, wac_ref, bmap_ref, wb_ref, w2_ref, b2_ref, o_ref):
        wac, wb, w2 = wac_ref[...], wb_ref[...], w2_ref[...]
        bmap, b2 = bmap_ref[...], b2_ref[...]
        for b in range(B):                               # static unroll over the batch block
            xp = xp_ref[b]                                                  # (Cin, PADLEN)
            # convA == fc1 o zero-pad o ConvTranspose: single im2col MXU dot.
            pa = jnp.concatenate([xp[:, t:t + NA] for t in taps], axis=0)   # (9*Cin, NA)
            ya = jnp.dot(wac, pa, preferred_element_type=jnp.float32) + bmap  # (Ch, NA) f32
            # RepConv main conv (kernel = weight + convmap(weight)), valid, no bias.
            yam = ya.astype(mxu_dtype)
            pb = jnp.concatenate([yam[:, t:t + NB] for t in taps], axis=0)  # (9*Ch, NB)
            yb = jnp.dot(wb, pb, preferred_element_type=jnp.float32)        # (Ch, NB) f32
            # exact-erf GELU (f32) -> Dropout(p=0) == identity -> fc2.
            g = _gelu_exact(yb)
            out = jnp.dot(w2, g.astype(mxu_dtype),
                          preferred_element_type=jnp.float32) + b2          # (Cout, NB)
            o_ref[b] = out.astype(o_ref.dtype)            # lane-dense: NB % 128 == 0

    return kernel


def _make_relu_kernel(Wp, NA, NB, B, mxu_dtype):
    """linear=True path.  The ReLU blocks folding fc1 into the ConvTranspose, so
    fc1 stays in-kernel, but it runs over the pre-padded image and the zero
    border is restored with a precomputed interior mask (no pad scratch)."""
    taps = [dy * Wp + dx for dy in range(3) for dx in range(3)]

    def kernel(xp_ref, w1_ref, b1_ref, mask_ref, wa_ref, ba_ref, wb_ref,
               w2_ref, b2_ref, o_ref):
        w1, wa, wb, w2 = w1_ref[...], wa_ref[...], wb_ref[...], w2_ref[...]
        b1, ba, b2, mask = b1_ref[...], ba_ref[...], b2_ref[...], mask_ref[...]
        for b in range(B):
            xp = xp_ref[b]                                                  # (Cin, PADLEN)
            h = jnp.dot(w1, xp, preferred_element_type=jnp.float32) + b1    # (Ch, PADLEN)
            h = jnp.maximum(h, 0.0) * mask      # == zero-pad(relu(fc1(x))) without stores
            hm = h.astype(mxu_dtype)
            pa = jnp.concatenate([hm[:, t:t + NA] for t in taps], axis=0)   # (9*Ch, NA)
            ya = jnp.dot(wa, pa, preferred_element_type=jnp.float32) + ba
            yam = ya.astype(mxu_dtype)
            pb = jnp.concatenate([yam[:, t:t + NB] for t in taps], axis=0)  # (9*Ch, NB)
            yb = jnp.dot(wb, pb, preferred_element_type=jnp.float32)
            g = _gelu_exact(yb)
            out = jnp.dot(w2, g.astype(mxu_dtype),
                          preferred_element_type=jnp.float32) + b2
            o_ref[b] = out.astype(o_ref.dtype)

    return kernel


# --------------------------- parameter preparation --------------------------

def make_rep_kernel(rep_weight, convmap_w):
    """RepConv kernel generation: weight + depthwise-3x3-conv(weight), pad=1.

    Tiny weight preprocessing (operates on 3x3 kernels) -> plain JAX in the wrapper.
    rep_weight: (C, C, 3, 3), convmap_w: (C*C, 1, 3, 3).  Returns (C, C, 3, 3).
    """
    C = rep_weight.shape[0]
    CC = C * C
    wf = rep_weight.reshape(CC, 3, 3)
    wfp = jnp.pad(wf, ((0, 0), (1, 1), (1, 1)))
    mapped = jnp.zeros_like(wf)
    for a in range(3):
        for b in range(3):
            mapped = mapped + wfp[:, a:a + 3, b:b + 3] * convmap_w[:, 0, a, b][:, None, None]
    return rep_weight + mapped.reshape(C, C, 3, 3)


# ------------------------------- forward pass --------------------------------

def mlp_forward(x_nchw, p, *, linear=False, mxu_dtype=jnp.bfloat16, max_batch_block=4):
    N, Cin, H, W = x_nchw.shape
    Ch = p["w1_pt"].shape[0]
    Cout = p["w2_pt"].shape[0]

    Wp, Hp = W + 4, H + 4                              # pad=2 each side (ConvTranspose)
    NB = _round_up(H * Wp, 128)                        # lane-dense output width
    NA = _round_up(NB + 2 * Wp + 2, 128)               # convA full-width extent
    PADLEN = _round_up(max(Hp * Wp, NA + 2 * Wp + 2), 128)  # lane-dense padded input width
    B = _pick_batch_block(N, max_batch_block)
    taps = [dy * Wp + dx for dy in range(3) for dx in range(3)]

    # ---- weight / bias preprocessing (tiny, host-side) ----
    w1 = p["w1_pt"][:, :, 0, 0]                                             # (Ch, Cin)
    b1 = p["b1"]                                                            # (Ch,)
    # ConvTranspose2d(C,C,3,s=1) == valid 3x3 conv on the 2-zero-padded input with the
    # channel-swapped, spatially-flipped kernel: wa[o, tap*Ch+i] = wt_pt[i,o,2-dy,2-dx].
    wa = jnp.transpose(p["wt_pt"][:, :, ::-1, ::-1], (1, 2, 3, 0)).reshape(Ch, 9 * Ch)
    ba = p["bt"].reshape(Ch, 1)
    k_pt = make_rep_kernel(p["rep_weight"], p["convmap_w"])                 # (Ch, Ch, 3, 3)
    wb = jnp.transpose(k_pt, (0, 2, 3, 1)).reshape(Ch, 9 * Ch)
    w2 = p["w2_pt"][:, :, 0, 0]                                             # (Cout, Ch)
    b2 = p["b2"].reshape(Cout, 1)

    # ---- pad the input ONCE in HBM (removes every in-kernel padding store) ----
    xpad = jnp.pad(x_nchw, ((0, 0), (0, 0), (2, 2), (2, 2))).reshape(N, Cin, Hp * Wp)
    xpad = jnp.pad(xpad, ((0, 0), (0, 0), (0, PADLEN - Hp * Wp))).astype(mxu_dtype)

    # Interior indicator of the padded image (where the fc1 bias actually exists).
    interior = jnp.zeros((Hp, Wp), jnp.float32).at[2:2 + H, 2:2 + W].set(1.0)
    mask_flat = jnp.zeros((PADLEN,), jnp.float32).at[:Hp * Wp].set(interior.reshape(-1))

    cparams = pltpu.CompilerParams(
        dimension_semantics=("parallel",),
        vmem_limit_bytes=32 * 1024 * 1024,   # explicit; tiny blocks, fits v7x's 64 MiB/core
    )
    in_bytes = int(xpad.size) * jnp.dtype(mxu_dtype).itemsize
    out_bytes = N * Cout * NB * 4

    if not linear:
        # Fold fc1 -> zero-pad -> ConvTranspose into ONE 3x3 conv:
        #   wa_c[o, tap*Cin+i] = sum_c wa[o, tap*Ch+c] * w1[c, i]
        #   bmap[o, p] = bt[o] + sum_tap (sum_c wa[o,tap*Ch+c]*b1[c]) * interior(p+off_tap)
        wa3 = wa.reshape(Ch, 9, Ch)
        wac = jnp.einsum("otc,ci->oti", wa3, w1).reshape(Ch, 9 * Cin)
        wb1 = jnp.einsum("otc,c->ot", wa3, b1)                              # (Ch, 9)
        mask_taps = jnp.stack([mask_flat[t:t + NA] for t in taps], axis=0)  # (9, NA)
        bmap = ba + wb1 @ mask_taps                                         # (Ch, NA)

        flops = 2 * N * (9 * Cin * Ch * NA + 9 * Ch * Ch * NB + Ch * Cout * NB)
        out_full = pl.pallas_call(
            _make_folded_kernel(Wp, NA, NB, B, mxu_dtype),
            grid=(N // B,),
            in_specs=[
                pl.BlockSpec((B, Cin, PADLEN), lambda n: (n, 0, 0)),
                pl.BlockSpec((Ch, 9 * Cin), lambda n: (0, 0)),
                pl.BlockSpec((Ch, NA), lambda n: (0, 0)),
                pl.BlockSpec((Ch, 9 * Ch), lambda n: (0, 0)),
                pl.BlockSpec((Cout, Ch), lambda n: (0, 0)),
                pl.BlockSpec((Cout, 1), lambda n: (0, 0)),
            ],
            out_specs=pl.BlockSpec((B, Cout, NB), lambda n: (n, 0, 0)),
            out_shape=jax.ShapeDtypeStruct((N, Cout, NB), jnp.float32),
            compiler_params=cparams,
            cost_estimate=pl.CostEstimate(
                flops=int(flops),
                transcendentals=int(2 * N * Ch * NB),
                bytes_accessed=int(in_bytes + out_bytes)),
        )(xpad, wac.astype(mxu_dtype), bmap, wb.astype(mxu_dtype),
          w2.astype(mxu_dtype), b2)
    else:
        # TODO(synk): the ReLU prevents folding fc1 into the ConvTranspose; fc1 stays
        # in-kernel (over the pre-padded image, border re-zeroed with the mask).
        flops = 2 * N * (Cin * Ch * PADLEN + 9 * Ch * Ch * NA
                         + 9 * Ch * Ch * NB + Ch * Cout * NB)
        out_full = pl.pallas_call(
            _make_relu_kernel(Wp, NA, NB, B, mxu_dtype),
            grid=(N // B,),
            in_specs=[
                pl.BlockSpec((B, Cin, PADLEN), lambda n: (n, 0, 0)),
                pl.BlockSpec((Ch, Cin), lambda n: (0, 0)),
                pl.BlockSpec((Ch, 1), lambda n: (0, 0)),
                pl.BlockSpec((1, PADLEN), lambda n: (0, 0)),
                pl.BlockSpec((Ch, 9 * Ch), lambda n: (0, 0)),
                pl.BlockSpec((Ch, 1), lambda n: (0, 0)),
                pl.BlockSpec((Ch, 9 * Ch), lambda n: (0, 0)),
                pl.BlockSpec((Cout, Ch), lambda n: (0, 0)),
                pl.BlockSpec((Cout, 1), lambda n: (0, 0)),
            ],
            out_specs=pl.BlockSpec((B, Cout, NB), lambda n: (n, 0, 0)),
            out_shape=jax.ShapeDtypeStruct((N, Cout, NB), jnp.float32),
            compiler_params=cparams,
            cost_estimate=pl.CostEstimate(
                flops=int(flops),
                transcendentals=int(2 * N * Ch * NB),
                bytes_accessed=int(in_bytes + out_bytes)),
        )(xpad, w1.astype(mxu_dtype), b1.reshape(Ch, 1),
          mask_flat.reshape(1, PADLEN), wa.astype(mxu_dtype), ba,
          wb.astype(mxu_dtype), w2.astype(mxu_dtype), b2)

    # Drop the extra lane-padding columns + full-width wrap columns, restore NCHW.
    return out_full[:, :, :H * Wp].reshape(N, Cout, H, Wp)[:, :, :, :W]


# ------------------------------- reference (XLA) ------------------------------

def mlp_reference(x, p, *, linear=False):
    dn = ("NCHW", "OIHW", "NCHW")
    hi = lax.Precision.HIGHEST
    h = lax.conv_general_dilated(x, p["w1_pt"], (1, 1), "VALID",
                                 dimension_numbers=dn, precision=hi)
    h = h + p["b1"][None, :, None, None]
    if linear:
        h = jnp.maximum(h, 0.0)
    wt = jnp.transpose(p["wt_pt"][:, :, ::-1, ::-1], (1, 0, 2, 3))   # OIHW
    y = lax.conv_general_dilated(h, wt, (1, 1), [(2, 2), (2, 2)],
                                 dimension_numbers=dn, precision=hi)
    y = y + p["bt"][None, :, None, None]
    k_pt = make_rep_kernel(p["rep_weight"], p["convmap_w"])
    y = lax.conv_general_dilated(y, k_pt, (1, 1), "VALID",
                                 dimension_numbers=dn, precision=hi)
    y = jax.nn.gelu(y, approximate=False)
    o = lax.conv_general_dilated(y, p["w2_pt"], (1, 1), "VALID",
                                 dimension_numbers=dn, precision=hi)
    return o + p["b2"][None, :, None, None]


# ----------------------------------- main -------------------------------------

if __name__ == "__main__":
    key = jax.random.PRNGKey(0)
    keys = jax.random.split(key, 9)

    N, C_IN, H, W = 4, 4, 16, 16      # N=4 -> batch block B=2, grid=(2,) (v7x-balanced)
    C_HID = 8
    C_OUT = C_IN                      # out_features defaults to in_features

    p = {
        "w1_pt": 0.5 * jax.random.normal(keys[0], (C_HID, C_IN, 1, 1), jnp.float32),
        "b1": 0.1 * jax.random.normal(keys[1], (C_HID,), jnp.float32),
        # PyTorch inits this buffer to zeros; random here for a non-trivial test.
        "rep_weight": 0.3 * jax.random.normal(keys[2], (C_HID, C_HID, 3, 3), jnp.float32),
        "convmap_w": 0.3 * jax.random.normal(keys[3], (C_HID * C_HID, 1, 3, 3), jnp.float32),
        "wt_pt": 0.3 * jax.random.normal(keys[4], (C_HID, C_HID, 3, 3), jnp.float32),  # (in,out,kh,kw)
        "bt": 0.1 * jax.random.normal(keys[5], (C_HID,), jnp.float32),
        "w2_pt": 0.5 * jax.random.normal(keys[6], (C_OUT, C_HID, 1, 1), jnp.float32),
        "b2": 0.1 * jax.random.normal(keys[7], (C_OUT,), jnp.float32),
    }
    x = jax.random.normal(keys[8], (N, C_IN, H, W), jnp.float32)

    ref = np.asarray(mlp_reference(x, p, linear=False))

    # f32-operand path: tight check (atol covers the EUP approximate reciprocal
    # used inside the in-kernel erf; output RMS is ~8, so this is <0.2% of scale).
    out_f32 = jax.block_until_ready(mlp_forward(x, p, linear=False, mxu_dtype=jnp.float32))
    np.testing.assert_allclose(np.asarray(out_f32), ref, rtol=5e-3, atol=1e-2)

    # Default bf16-MXU-operand path (v6e/v7x fast path): bf16-level tolerance; the
    # two chained 3x3 convs amplify the 2^-8 operand rounding, so the absolute
    # term is scaled by the output RMS.
    out_bf16 = jax.block_until_ready(mlp_forward(x, p, linear=False))
    rms = float(np.sqrt(np.mean(ref ** 2)))
    np.testing.assert_allclose(np.asarray(out_bf16), ref, rtol=3e-2, atol=3e-2 * rms)

    # linear=True variant (ReLU after fc1), f32 operands.
    ref_lin = np.asarray(mlp_reference(x, p, linear=True))
    out_lin = jax.block_until_ready(mlp_forward(x, p, linear=True, mxu_dtype=jnp.float32))
    np.testing.assert_allclose(np.asarray(out_lin), ref_lin, rtol=5e-3, atol=1e-2)

    assert out_bf16.shape == (N, C_OUT, H, W)
    print("KERNEL_OK")
</pallas_src>

<mosaic_0001>
module attributes {stable_mosaic.version = 11 : i64} {
  func.func @kernel(%arg0: i32, %arg1: memref<2x4x640xf32, #tpu.memory_space<vmem>>, %arg2: memref<8x36xf32, #tpu.memory_space<vmem>>, %arg3: memref<8x512xf32, #tpu.memory_space<vmem>>, %arg4: memref<8x72xf32, #tpu.memory_space<vmem>>, %arg5: memref<4x8xf32, #tpu.memory_space<vmem>>, %arg6: memref<4x1xf32, #tpu.memory_space<vmem>>, %arg7: memref<2x4x384xf32, #tpu.memory_space<vmem>>) attributes {dimension_semantics = [#tpu.dimension_semantics<parallel>], iteration_bounds = array<i64: 2>, scalar_prefetch = 0 : i64, scratch_operands = 0 : i64, tpu.core_type = #tpu.core_type<tc>, window_params = [{transform_indices = @transform_0, window_bounds = array<i64: 2, 4, 640>}, {pipeline_mode = #tpu.pipeline_mode<synchronous>, transform_indices = @transform_1, window_bounds = array<i64: 8, 36>}, {pipeline_mode = #tpu.pipeline_mode<synchronous>, transform_indices = @transform_2, window_bounds = array<i64: 8, 512>}, {pipeline_mode = #tpu.pipeline_mode<synchronous>, transform_indices = @transform_3, window_bounds = array<i64: 8, 72>}, {pipeline_mode = #tpu.pipeline_mode<synchronous>, transform_indices = @transform_4, window_bounds = array<i64: 4, 8>}, {pipeline_mode = #tpu.pipeline_mode<synchronous>, transform_indices = @transform_5, window_bounds = array<i64: 4, 1>}, {transform_indices = @transform_6, window_bounds = array<i64: 2, 4, 384>}]} {
    %c0 = arith.constant 0 : index
    %c0_0 = arith.constant 0 : index
    %0 = vector.load %arg2[%c0, %c0_0] : memref<8x36xf32, #tpu.memory_space<vmem>>, vector<8x36xf32>
    %c0_1 = arith.constant 0 : index
    %c0_2 = arith.constant 0 : index
    %1 = vector.load %arg4[%c0_1, %c0_2] : memref<8x72xf32, #tpu.memory_space<vmem>>, vector<8x72xf32>
    %c0_3 = arith.constant 0 : index
    %c0_4 = arith.constant 0 : index
    %2 = vector.load %arg5[%c0_3, %c0_4] : memref<4x8xf32, #tpu.memory_space<vmem>>, vector<4x8xf32>
    %c0_5 = arith.constant 0 : index
    %c0_6 = arith.constant 0 : index
    %3 = vector.load %arg3[%c0_5, %c0_6] : memref<8x512xf32, #tpu.memory_space<vmem>>, vector<8x512xf32>
    %c0_7 = arith.constant 0 : index
    %c0_8 = arith.constant 0 : index
    %4 = vector.load %arg6[%c0_7, %c0_8] : memref<4x1xf32, #tpu.memory_space<vmem>>, vector<4x1xf32>
    %c0_9 = arith.constant 0 : index
    %c0_10 = arith.constant 0 : index
    %c0_11 = arith.constant 0 : index
    %5 = vector.load %arg1[%c0_9, %c0_10, %c0_11] : memref<2x4x640xf32, #tpu.memory_space<vmem>>, vector<1x4x640xf32>
    %6 = vector.shape_cast %5 : vector<1x4x640xf32> to vector<4x640xf32>
    %7 = vector.extract_strided_slice %6 {offsets = [0, 0], sizes = [4, 512], strides = [1, 1]} : vector<4x640xf32> to vector<4x512xf32>
    %8 = vector.extract_strided_slice %6 {offsets = [0, 1], sizes = [4, 512], strides = [1, 1]} : vector<4x640xf32> to vector<4x512xf32>
    %9 = vector.extract_strided_slice %6 {offsets = [0, 2], sizes = [4, 512], strides = [1, 1]} : vector<4x640xf32> to vector<4x512xf32>
    %10 = vector.extract_strided_slice %6 {offsets = [0, 20], sizes = [4, 512], strides = [1, 1]} : vector<4x640xf32> to vector<4x512xf32>
    %11 = vector.extract_strided_slice %6 {offsets = [0, 21], sizes = [4, 512], strides = [1, 1]} : vector<4x640xf32> to vector<4x512xf32>
    %12 = vector.extract_strided_slice %6 {offsets = [0, 22], sizes = [4, 512], strides = [1, 1]} : vector<4x640xf32> to vector<4x512xf32>
    %13 = vector.extract_strided_slice %6 {offsets = [0, 40], sizes = [4, 512], strides = [1, 1]} : vector<4x640xf32> to vector<4x512xf32>
    %14 = vector.extract_strided_slice %6 {offsets = [0, 41], sizes = [4, 512], strides = [1, 1]} : vector<4x640xf32> to vector<4x512xf32>
    %15 = vector.extract_strided_slice %6 {offsets = [0, 42], sizes = [4, 512], strides = [1, 1]} : vector<4x640xf32> to vector<4x512xf32>
    %16 = tpu.concatenate %7, %8, %9, %10, %11, %12, %13, %14, %15 in 0 : vector<4x512xf32>, vector<4x512xf32>, vector<4x512xf32>, vector<4x512xf32>, vector<4x512xf32>, vector<4x512xf32>, vector<4x512xf32>, vector<4x512xf32>, vector<4x512xf32> -> vector<36x512xf32>
    %cst = arith.constant dense<0.000000e+00> : vector<8x512xf32>
    %17 = tpu.matmul %0, %16, %cst {dimension_numbers = #tpu.dot_dimension_numbers<[1], [0], [0], [1], [0, 0, 1, 1], [], []>} : vector<8x36xf32>, vector<36x512xf32>, vector<8x512xf32> -> vector<8x512xf32>
    %18 = arith.addf %17, %3 : vector<8x512xf32>
    %19 = vector.extract_strided_slice %18 {offsets = [0, 0], sizes = [8, 384], strides = [1, 1]} : vector<8x512xf32> to vector<8x384xf32>
    %20 = vector.extract_strided_slice %18 {offsets = [0, 1], sizes = [8, 384], strides = [1, 1]} : vector<8x512xf32> to vector<8x384xf32>
    %21 = vector.extract_strided_slice %18 {offsets = [0, 2], sizes = [8, 384], strides = [1, 1]} : vector<8x512xf32> to vector<8x384xf32>
    %22 = vector.extract_strided_slice %18 {offsets = [0, 20], sizes = [8, 384], strides = [1, 1]} : vector<8x512xf32> to vector<8x384xf32>
    %23 = vector.extract_strided_slice %18 {offsets = [0, 21], sizes = [8, 384], strides = [1, 1]} : vector<8x512xf32> to vector<8x384xf32>
    %24 = vector.extract_strided_slice %18 {offsets = [0, 22], sizes = [8, 384], strides = [1, 1]} : vector<8x512xf32> to vector<8x384xf32>
    %25 = vector.extract_strided_slice %18 {offsets = [0, 40], sizes = [8, 384], strides = [1, 1]} : vector<8x512xf32> to vector<8x384xf32>
    %26 = vector.extract_strided_slice %18 {offsets = [0, 41], sizes = [8, 384], strides = [1, 1]} : vector<8x512xf32> to vector<8x384xf32>
    %27 = vector.extract_strided_slice %18 {offsets = [0, 42], sizes = [8, 384], strides = [1, 1]} : vector<8x512xf32> to vector<8x384xf32>
    %28 = tpu.concatenate %19, %20, %21, %22, %23, %24, %25, %26, %27 in 0 : vector<8x384xf32>, vector<8x384xf32>, vector<8x384xf32>, vector<8x384xf32>, vector<8x384xf32>, vector<8x384xf32>, vector<8x384xf32>, vector<8x384xf32>, vector<8x384xf32> -> vector<72x384xf32>
    %cst_12 = arith.constant dense<0.000000e+00> : vector<8x384xf32>
    %29 = tpu.matmul %1, %28, %cst_12 {dimension_numbers = #tpu.dot_dimension_numbers<[1], [0], [0], [1], [0, 0, 1, 1], [], []>} : vector<8x72xf32>, vector<72x384xf32>, vector<8x384xf32> -> vector<8x384xf32>
    %cst_13 = arith.constant 5.000000e-01 : f32
    %30 = vector.broadcast %cst_13 : f32 to vector<8x384xf32>
    %31 = arith.mulf %30, %29 : vector<8x384xf32>
    %cst_14 = arith.constant 0.707106769 : f32
    %32 = vector.broadcast %cst_14 : f32 to vector<8x384xf32>
    %33 = arith.mulf %29, %32 : vector<8x384xf32>
    %34 = math.absf %33 : vector<8x384xf32>
    %cst_15 = arith.constant 0.327591091 : f32
    %35 = vector.broadcast %cst_15 : f32 to vector<8x384xf32>
    %36 = arith.mulf %35, %34 : vector<8x384xf32>
    %cst_16 = arith.constant 1.000000e+00 : f32
    %37 = vector.broadcast %cst_16 : f32 to vector<8x384xf32>
    %38 = arith.addf %37, %36 : vector<8x384xf32>
    %39 = tpu.reciprocal %38 {approx = true} : vector<8x384xf32> -> vector<8x384xf32>
    %cst_17 = arith.constant 1.06140542 : f32
    %40 = vector.broadcast %cst_17 : f32 to vector<8x384xf32>
    %41 = arith.mulf %40, %39 : vector<8x384xf32>
    %cst_18 = arith.constant -1.45315206 : f32
    %42 = vector.broadcast %cst_18 : f32 to vector<8x384xf32>
    %43 = arith.addf %41, %42 : vector<8x384xf32>
    %44 = arith.mulf %43, %39 : vector<8x384xf32>
    %cst_19 = arith.constant 1.42141378 : f32
    %45 = vector.broadcast %cst_19 : f32 to vector<8x384xf32>
    %46 = arith.addf %44, %45 : vector<8x384xf32>
    %47 = arith.mulf %46, %39 : vector<8x384xf32>
    %cst_20 = arith.constant -0.284496725 : f32
    %48 = vector.broadcast %cst_20 : f32 to vector<8x384xf32>
    %49 = arith.addf %47, %48 : vector<8x384xf32>
    %50 = arith.mulf %49, %39 : vector<8x384xf32>
    %cst_21 = arith.constant 0.254829586 : f32
    %51 = vector.broadcast %cst_21 : f32 to vector<8x384xf32>
    %52 = arith.addf %50, %51 : vector<8x384xf32>
    %53 = arith.mulf %52, %39 : vector<8x384xf32>
    %cst_22 = arith.constant 0.000000e+00 : f32
    %54 = vector.broadcast %cst_22 : f32 to vector<8x384xf32>
    %55 = arith.subf %54, %34 : vector<8x384xf32>
    %56 = arith.mulf %55, %34 : vector<8x384xf32>
    %57 = math.exp %56 : vector<8x384xf32>
    %58 = arith.mulf %53, %57 : vector<8x384xf32>
    %cst_23 = arith.constant 1.000000e+00 : f32
    %59 = vector.broadcast %cst_23 : f32 to vector<8x384xf32>
    %60 = arith.subf %59, %58 : vector<8x384xf32>
    %cst_24 = arith.constant 0.000000e+00 : f32
    %61 = vector.broadcast %cst_24 : f32 to vector<8x384xf32>
    %62 = arith.cmpf olt, %33, %61 : vector<8x384xf32>
    %cst_25 = arith.constant 0.000000e+00 : f32
    %63 = vector.broadcast %cst_25 : f32 to vector<8x384xf32>
    %64 = arith.subf %63, %60 : vector<8x384xf32>
    %65 = arith.select %62, %64, %60 : vector<8x384xi1>, vector<8x384xf32>
    %cst_26 = arith.constant 1.000000e+00 : f32
    %66 = vector.broadcast %cst_26 : f32 to vector<8x384xf32>
    %67 = arith.addf %66, %65 : vector<8x384xf32>
    %68 = arith.mulf %31, %67 : vector<8x384xf32>
    %cst_27 = arith.constant dense<0.000000e+00> : vector<4x384xf32>
    %69 = tpu.matmul %2, %68, %cst_27 {dimension_numbers = #tpu.dot_dimension_numbers<[1], [0], [0], [1], [0, 0, 1, 1], [], []>} : vector<4x8xf32>, vector<8x384xf32>, vector<4x384xf32> -> vector<4x384xf32>
    %70 = vector.broadcast %4 : vector<4x1xf32> to vector<4x384xf32>
    %71 = arith.addf %69, %70 : vector<4x384xf32>
    %c0_28 = arith.constant 0 : index
    %c0_29 = arith.constant 0 : index
    %c0_30 = arith.constant 0 : index
    %72 = vector.load %arg7[%c0_28, %c0_29, %c0_30] : memref<2x4x384xf32, #tpu.memory_space<vmem>>, vector<1x4x384xf32>
    %73 = vector.shape_cast %72 : vector<1x4x384xf32> to vector<4x384xf32>
    %74 = vector.shape_cast %71 : vector<4x384xf32> to vector<1x4x384xf32>
    tpu.vector_store %arg7[%c0_28, %c0_29, %c0_30], %74 {strides = array<i32>} : memref<2x4x384xf32, #tpu.memory_space<vmem>>, vector<1x4x384xf32>,
    %c1 = arith.constant 1 : index
    %c0_31 = arith.constant 0 : index
    %c0_32 = arith.constant 0 : index
    %75 = vector.load %arg1[%c1, %c0_31, %c0_32] : memref<2x4x640xf32, #tpu.memory_space<vmem>>, vector<1x4x640xf32>
    %76 = vector.shape_cast %75 : vector<1x4x640xf32> to vector<4x640xf32>
    %77 = vector.extract_strided_slice %76 {offsets = [0, 0], sizes = [4, 512], strides = [1, 1]} : vector<4x640xf32> to vector<4x512xf32>
    %78 = vector.extract_strided_slice %76 {offsets = [0, 1], sizes = [4, 512], strides = [1, 1]} : vector<4x640xf32> to vector<4x512xf32>
    %79 = vector.extract_strided_slice %76 {offsets = [0, 2], sizes = [4, 512], strides = [1, 1]} : vector<4x640xf32> to vector<4x512xf32>
    %80 = vector.extract_strided_slice %76 {offsets = [0, 20], sizes = [4, 512], strides = [1, 1]} : vector<4x640xf32> to vector<4x512xf32>
    %81 = vector.extract_strided_slice %76 {offsets = [0, 21], sizes = [4, 512], strides = [1, 1]} : vector<4x640xf32> to vector<4x512xf32>
    %82 = vector.extract_strided_slice %76 {offsets = [0, 22], sizes = [4, 512], strides = [1, 1]} : vector<4x640xf32> to vector<4x512xf32>
    %83 = vector.extract_strided_slice %76 {offsets = [0, 40], sizes = [4, 512], strides = [1, 1]} : vector<4x640xf32> to vector<4x512xf32>
    %84 = vector.extract_strided_slice %76 {offsets = [0, 41], sizes = [4, 512], strides = [1, 1]} : vector<4x640xf32> to vector<4x512xf32>
    %85 = vector.extract_strided_slice %76 {offsets = [0, 42], sizes = [4, 512], strides = [1, 1]} : vector<4x640xf32> to vector<4x512xf32>
    %86 = tpu.concatenate %77, %78, %79, %80, %81, %82, %83, %84, %85 in 0 : vector<4x512xf32>, vector<4x512xf32>, vector<4x512xf32>, vector<4x512xf32>, vector<4x512xf32>, vector<4x512xf32>, vector<4x512xf32>, vector<4x512xf32>, vector<4x512xf32> -> vector<36x512xf32>
    %cst_33 = arith.constant dense<0.000000e+00> : vector<8x512xf32>
    %87 = tpu.matmul %0, %86, %cst_33 {dimension_numbers = #tpu.dot_dimension_numbers<[1], [0], [0], [1], [0, 0, 1, 1], [], []>} : vector<8x36xf32>, vector<36x512xf32>, vector<8x512xf32> -> vector<8x512xf32>
    %88 = arith.addf %87, %3 : vector<8x512xf32>
    %89 = vector.extract_strided_slice %88 {offsets = [0, 0], sizes = [8, 384], strides = [1, 1]} : vector<8x512xf32> to vector<8x384xf32>
    %90 = vector.extract_strided_slice %88 {offsets = [0, 1], sizes = [8, 384], strides = [1, 1]} : vector<8x512xf32> to vector<8x384xf32>
    %91 = vector.extract_strided_slice %88 {offsets = [0, 2], sizes = [8, 384], strides = [1, 1]} : vector<8x512xf32> to vector<8x384xf32>
    %92 = vector.extract_strided_slice %88 {offsets = [0, 20], sizes = [8, 384], strides = [1, 1]} : vector<8x512xf32> to vector<8x384xf32>
    %93 = vector.extract_strided_slice %88 {offsets = [0, 21], sizes = [8, 384], strides = [1, 1]} : vector<8x512xf32> to vector<8x384xf32>
    %94 = vector.extract_strided_slice %88 {offsets = [0, 22], sizes = [8, 384], strides = [1, 1]} : vector<8x512xf32> to vector<8x384xf32>
    %95 = vector.extract_strided_slice %88 {offsets = [0, 40], sizes = [8, 384], strides = [1, 1]} : vector<8x512xf32> to vector<8x384xf32>
    %96 = vector.extract_strided_slice %88 {offsets = [0, 41], sizes = [8, 384], strides = [1, 1]} : vector<8x512xf32> to vector<8x384xf32>
    %97 = vector.extract_strided_slice %88 {offsets = [0, 42], sizes = [8, 384], strides = [1, 1]} : vector<8x512xf32> to vector<8x384xf32>
    %98 = tpu.concatenate %89, %90, %91, %92, %93, %94, %95, %96, %97 in 0 : vector<8x384xf32>, vector<8x384xf32>, vector<8x384xf32>, vector<8x384xf32>, vector<8x384xf32>, vector<8x384xf32>, vector<8x384xf32>, vector<8x384xf32>, vector<8x384xf32> -> vector<72x384xf32>
    %cst_34 = arith.constant dense<0.000000e+00> : vector<8x384xf32>
    %99 = tpu.matmul %1, %98, %cst_34 {dimension_numbers = #tpu.dot_dimension_numbers<[1], [0], [0], [1], [0, 0, 1, 1], [], []>} : vector<8x72xf32>, vector<72x384xf32>, vector<8x384xf32> -> vector<8x384xf32>
    %cst_35 = arith.constant 5.000000e-01 : f32
    %100 = vector.broadcast %cst_35 : f32 to vector<8x384xf32>
    %101 = arith.mulf %100, %99 : vector<8x384xf32>
    %cst_36 = arith.constant 0.707106769 : f32
    %102 = vector.broadcast %cst_36 : f32 to vector<8x384xf32>
    %103 = arith.mulf %99, %102 : vector<8x384xf32>
    %104 = math.absf %103 : vector<8x384xf32>
    %cst_37 = arith.constant 0.327591091 : f32
    %105 = vector.broadcast %cst_37 : f32 to vector<8x384xf32>
    %106 = arith.mulf %105, %104 : vector<8x384xf32>
    %cst_38 = arith.constant 1.000000e+00 : f32
    %107 = vector.broadcast %cst_38 : f32 to vector<8x384xf32>
    %108 = arith.addf %107, %106 : vector<8x384xf32>
    %109 = tpu.reciprocal %108 {approx = true} : vector<8x384xf32> -> vector<8x384xf32>
    %cst_39 = arith.constant 1.06140542 : f32
    %110 = vector.broadcast %cst_39 : f32 to vector<8x384xf32>
    %111 = arith.mulf %110, %109 : vector<8x384xf32>
    %cst_40 = arith.constant -1.45315206 : f32
    %112 = vector.broadcast %cst_40 : f32 to vector<8x384xf32>
    %113 = arith.addf %111, %112 : vector<8x384xf32>
    %114 = arith.mulf %113, %109 : vector<8x384xf32>
    %cst_41 = arith.constant 1.42141378 : f32
    %115 = vector.broadcast %cst_41 : f32 to vector<8x384xf32>
    %116 = arith.addf %114, %115 : vector<8x384xf32>
    %117 = arith.mulf %116, %109 : vector<8x384xf32>
    %cst_42 = arith.constant -0.284496725 : f32
    %118 = vector.broadcast %cst_42 : f32 to vector<8x384xf32>
    %119 = arith.addf %117, %118 : vector<8x384xf32>
    %120 = arith.mulf %119, %109 : vector<8x384xf32>
    %cst_43 = arith.constant 0.254829586 : f32
    %121 = vector.broadcast %cst_43 : f32 to vector<8x384xf32>
    %122 = arith.addf %120, %121 : vector<8x384xf32>
    %123 = arith.mulf %122, %109 : vector<8x384xf32>
    %cst_44 = arith.constant 0.000000e+00 : f32
    %124 = vector.broadcast %cst_44 : f32 to vector<8x384xf32>
    %125 = arith.subf %124, %104 : vector<8x384xf32>
    %126 = arith.mulf %125, %104 : vector<8x384xf32>
    %127 = math.exp %126 : vector<8x384xf32>
    %128 = arith.mulf %123, %127 : vector<8x384xf32>
    %cst_45 = arith.constant 1.000000e+00 : f32
    %129 = vector.broadcast %cst_45 : f32 to vector<8x384xf32>
    %130 = arith.subf %129, %128 : vector<8x384xf32>
    %cst_46 = arith.constant 0.000000e+00 : f32
    %131 = vector.broadcast %cst_46 : f32 to vector<8x384xf32>
    %132 = arith.cmpf olt, %103, %131 : vector<8x384xf32>
    %cst_47 = arith.constant 0.000000e+00 : f32
    %133 = vector.broadcast %cst_47 : f32 to vector<8x384xf32>
    %134 = arith.subf %133, %130 : vector<8x384xf32>
    %135 = arith.select %132, %134, %130 : vector<8x384xi1>, vector<8x384xf32>
    %cst_48 = arith.constant 1.000000e+00 : f32
    %136 = vector.broadcast %cst_48 : f32 to vector<8x384xf32>
    %137 = arith.addf %136, %135 : vector<8x384xf32>
    %138 = arith.mulf %101, %137 : vector<8x384xf32>
    %cst_49 = arith.constant dense<0.000000e+00> : vector<4x384xf32>
    %139 = tpu.matmul %2, %138, %cst_49 {dimension_numbers = #tpu.dot_dimension_numbers<[1], [0], [0], [1], [0, 0, 1, 1], [], []>} : vector<4x8xf32>, vector<8x384xf32>, vector<4x384xf32> -> vector<4x384xf32>
    %140 = vector.broadcast %4 : vector<4x1xf32> to vector<4x384xf32>
    %141 = arith.addf %139, %140 : vector<4x384xf32>
    %c1_50 = arith.constant 1 : index
    %c0_51 = arith.constant 0 : index
    %c0_52 = arith.constant 0 : index
    %142 = vector.load %arg7[%c1_50, %c0_51, %c0_52] : memref<2x4x384xf32, #tpu.memory_space<vmem>>, vector<1x4x384xf32>
    %143 = vector.shape_cast %142 : vector<1x4x384xf32> to vector<4x384xf32>
    %144 = vector.shape_cast %141 : vector<4x384xf32> to vector<1x4x384xf32>
    tpu.vector_store %arg7[%c1_50, %c0_51, %c0_52], %144 {strides = array<i32>} : memref<2x4x384xf32, #tpu.memory_space<vmem>>, vector<1x4x384xf32>,
    return
  }
  func.func @transform_0(%arg0: i32) -> (i32, i32, i32) {
    %c0_i32 = arith.constant 0 : i32
    %c0_i32_0 = arith.constant 0 : i32
    %c0_i32_1 = arith.constant 0 : i32
    return %arg0, %c0_i32, %c0_i32_0 : i32, i32, i32
  }
  func.func @transform_1(%arg0: i32) -> (i32, i32) {
    %c0_i32 = arith.constant 0 : i32
    %c0_i32_0 = arith.constant 0 : i32
    %c0_i32_1 = arith.constant 0 : i32
    return %c0_i32, %c0_i32_0 : i32, i32
  }
  func.func @transform_2(%arg0: i32) -> (i32, i32) {
    %c0_i32 = arith.constant 0 : i32
    %c0_i32_0 = arith.constant 0 : i32
    %c0_i32_1 = arith.constant 0 : i32
    return %c0_i32, %c0_i32_0 : i32, i32
  }
  func.func @transform_3(%arg0: i32) -> (i32, i32) {
    %c0_i32 = arith.constant 0 : i32
    %c0_i32_0 = arith.constant 0 : i32
    %c0_i32_1 = arith.constant 0 : i32
    return %c0_i32, %c0_i32_0 : i32, i32
  }
  func.func @transform_4(%arg0: i32) -> (i32, i32) {
    %c0_i32 = arith.constant 0 : i32
    %c0_i32_0 = arith.constant 0 : i32
    %c0_i32_1 = arith.constant 0 : i32
    return %c0_i32, %c0_i32_0 : i32, i32
  }
  func.func @transform_5(%arg0: i32) -> (i32, i32) {
    %c0_i32 = arith.constant 0 : i32
    %c0_i32_0 = arith.constant 0 : i32
    %c0_i32_1 = arith.constant 0 : i32
    return %c0_i32, %c0_i32_0 : i32, i32
  }
  func.func @transform_6(%arg0: i32) -> (i32, i32, i32) {
    %c0_i32 = arith.constant 0 : i32
    %c0_i32_0 = arith.constant 0 : i32
    %c0_i32_1 = arith.constant 0 : i32
    return %arg0, %c0_i32, %c0_i32_0 : i32, i32, i32
  }
}

</mosaic_0001>

<bundles_post_ra>
// kernel: tpu_custom_call.1
= control target key start
LH: loop header
LB: loop body
LE: loop exit
PB: predicated region body
PF: predicated region fallthrough
CT: control target
= control target key end

     0   :  { %11 = vsyncpa [#allocation3], 0  ;;  %s3628_s0 = inlined_call_operand.hbm [shape: f32[4,4,640], index: 0, kind: input, shape index: {}]   ;;  %s3629_s1 = inlined_call_operand.vmem [shape: f32[8,36], index: 1, kind: input, shape index: {}]   ;;  %s3630_s2 = inlined_call_operand.hbm [shape: f32[8,512], index: 2, kind: input, shape index: {}]   ;;  %s3631_s3 = inlined_call_operand.vmem [shape: f32[8,72], index: 3, kind: input, shape index: {}]   ;;  %s3632_s4 = inlined_call_operand.vmem [shape: f32[4,8], index: 4, kind: input, shape index: {}]   ;;  %s3633_s5 = inlined_call_operand.vmem [shape: f32[4,1], index: 5, kind: input, shape index: {}]   ;;  %s3634_s6 = inlined_call_operand.hbm [shape: f32[4,4,384], index: 6, kind: output, shape index: {}]  }
   0x1   :  { %13 = vsyncpa [#allocation3 + $0x1], 0 }
   0x2   :  { %14 = vsyncpa [#allocation6], 0 }
   0x3   :  { %15 = vsyncpa [#allocation4], 0 }
   0x4   :  { %17 = vsyncpa [#allocation4 + $0x1], 0  ;;  %s2802_s21 = smov 0   ;;  %s2804_s22 = smov 0  }
   0x5   :  { %s2806_s23 = smov 0   ;;  %s2808_s24 = smov 0  }
   0x6 LB: > { %s2823_s25 = sadd.s32 4294967295, %s2746_s24   ;;  %s2022_s26 = sadd.s32 4294967294, %s2746_s24   ;;  %s2746_s24 = sphi %s2808_s24, %s3659_s24   ;;  %s2742_s23 = sphi %s2806_s23, %s3658_s23   ;;  %s2738_s22 = sphi %s2804_s22, %s3657_s22   ;;  %s2734_s21 = sphi %s2802_s21, %s3656_s21  }
   0x7   : > { %s2827_s27 = sadd.s32 1, %s2746_s24   ;;  %s30_s28 = sadd.s32 1, %s2742_s23 }
   0x8   : > { %s27_s29 = ssub.s32 %s2746_s24, %s2827_s27  ;;  %p37_p0 = scmp.ne.s32.totalorder %s2742_s23, %s2738_s22 }
   0x9   : > { %p28_p1 = scmp.eq.s32.totalorder %s27_s29, 0  ;;  %p38_p2 = scmp.eq.s32.totalorder %s2746_s24, 0 }
   0xa   : > { %p43_p3 = scmp.ne.s32.totalorder %s2738_s22, %s2734_s21  ;;  %p3635_p4 = scmp.eq.s32.totalorder %s2823_s25, 0 }
   0xb   : > { %s2839_s30 = scalar_select %p28_p1, %s2742_s23, %s30_s28  }
   0xc   : > { %p2841_p5 = por %p38_p2, %p37_p0  ;;  %p2847_p6 = por %p3635_p4, %p43_p3 }
   0xd   : > { %p172_p7 = scmp.eq.s32.totalorder %s2823_s25, 1  ;;  %p178_p8 = scmp.eq.s32.totalorder %s2022_s26, 1 }
   0xe   : > { %s3641_s8 = scalar_select %p2847_p6, 1, 0 }
   0xf   : > { %p2023_p9 = scmp.ge.s32.totalorder %s2746_s24, 1  ;;  %p185_p10 = scmp.lt.s32.totalorder %s2746_s24, 3 }
  0x10   : > { %p2854_p11 = por %p172_p7, %p37_p0  ;;  %p2858_p12 = por %p178_p8, %p43_p3 }
  0x11   : > { %p2862_p13 = pnand %p2023_p9, %p185_p10  ;;  %s2748_s12 = smov [#allocation5]  }
  0x12   : > { %s3642_s9 = scalar_select %p2854_p11, 1, 0 }
  0x13   : > { %s3643_s10 = scalar_select %p2858_p12, 1, 0 }
  0x14   : > { %s3644_s11 = scalar_select %p2862_p13, 1, 0 }
  0x15   : > { %p2238_p2 = pneg %p2862_p13  ;;  %s201_s13 = sshll.u32 %s2748_s12, 4  ;;  %s202_s13 = int_to_ptr.vmem [resolvable:$true] %s201_s13 }
  0x16   : > { %p2251_p4 = scmp.lt.s32.totalorder %s2746_s24, 2  ;;  %p3645_p0 = scmp.eq.s32.totalorder %s2823_s25, 0 }
  0x17   : > { %s221_s15 = sand.u32 1, %s2742_s23   ;;  %s2618_s20 = scalar_lea.hbm %s3630_s2, 512 }
  0x18   : > { %p2872_p7 = pnand %p2238_p2, %p3645_p0  ;;  %p2879_p3 = pnand %p2251_p4, %p2841_p5 }
  0x19   : > { %s2225_s17 = smul.u32 40, %s221_s15  ;;  %p2619_p8 = scmp.ne.s32.totalorder %s3630_s2, %s2618_s20 }
  0x1a   : > { %s3647_s16 = scalar_select %p2879_p3, 1, 0 }
  0x1b   : > { %p2620_p9 = pneg %p2872_p7  ;;  %p2625_p4 = scmp.lt.u32.totalorder %s2618_s20, %s3630_s2 }
  0x1d   : > { %p2621_p10 = pnand %p2620_p9, %p2619_p8 }
  0x1f   : > { %p2622_p2 = pneg %p2621_p10 }
  0x21   : > { %p2627_p5 = pnand %p2625_p4, %p2622_p2 }
  0x23   : > { %2630 = shalt.err (!%p2627_p5)
}
  0x24   : > { %s2631_s7 = scalar_lea.vmem %s202_s13, 512  ;;  %p2639_p11 = scmp.lt.s32.totalorder %s202_s13, %s202_s13 }
  0x25   : > { %p2632_p0 = scmp.ne.s32.totalorder %s202_s13, %s2631_s7  ;;  %p2640_p6 = scmp.lt.s32.totalorder %s2631_s7, %s2631_s7 }
  0x27   : > { %p2634_p1 = pnand %p2632_p0, %p2620_p9  ;;  %p2641_p13 = por %p2640_p6, %p2639_p11 }
  0x29   : > { %p2635_p12 = pneg %p2634_p1 }
  0x2b   : > { %p2642_p3 = pnand %p2641_p13, %p2635_p12 }
  0x2d   : > { %2645 = shalt.err (!%p2642_p3)
}
  0x2e   : > { %2241 = dma.hbm_to_vmem [thread:$0]  (!%p2872_p7), %s3630_s2, 512, %s202_s13, [#allocation6]  }
  0x2f   : > { %s2226_s20 = smul.u32 640, %s2746_s24  ;;  %s225_s26 = scalar_lea.vmem [#allocation2], %s2225_s17 }
  0x30   : > { %s233_s28 = sshll.u32 %s225_s26, 4  ;;  %s2907_s14 = scalar_lea.sflag [#allocation3], %s221_s15  ;;  %s2900_s28 = int_to_ptr.vmem [resolvable:$true] %s233_s28 }
  0x31   : > { %s2905_s7 = scalar_lea.hbm %s3628_s0, %s2226_s20  ;;  %p3648_p11 = scmp.ne.s32.totalorder %s3647_s16, 0 }
  0x32   : > { %s2646_s18 = scalar_lea.hbm %s2905_s7, 640  ;;  %s2651_s19 = scalar_lea.hbm %s3628_s0, 1280 }
  0x33   : > { %p2647_p6 = scmp.ne.s32.totalorder %s2905_s7, %s2646_s18  ;;  %p2648_p12 = pneg %p3648_p11 }
  0x34   : > { %p2652_p7 = scmp.lt.u32.totalorder %s2905_s7, %s3628_s0  ;;  %p2653_p3 = scmp.lt.u32.totalorder %s2651_s19, %s2646_s18 }
  0x35   : > { %p2649_p13 = pnand %p2648_p12, %p2647_p6  ;;  %p2655_p9 = scmp.lt.u32.totalorder %s2646_s18, %s2905_s7 }
  0x36   : > { %p2654_p8 = por %p2653_p3, %p2652_p7 }
  0x37   : > { %p2650_p1 = pneg %p2649_p13 }
  0x38   : > { %p2656_p10 = por %p2655_p9, %p2654_p8 }
  0x3a   : > { %p2657_p2 = pnand %p2656_p10, %p2650_p1 }
  0x3c   : > { %2660 = shalt.err (!%p2657_p2)
}
  0x3d   : > { %s2661_s15 = scalar_lea.vmem %s2900_s28, 640  ;;  %s2749_s29 = smov [#allocation2]  }
  0x3e   : > { %p2662_p4 = scmp.ne.s32.totalorder %s2900_s28, %s2661_s15  ;;  %s2666_s12 = sshll.u32 %s2749_s29, 4  ;;  %s2667_s12 = int_to_ptr.vmem [resolvable:$false] %s2666_s12 }
  0x3f   : > { %s2668_s13 = scalar_lea.vmem %s2667_s12, 1280  ;;  %p2669_p6 = scmp.lt.s32.totalorder %s2900_s28, %s2667_s12 }
  0x40   : > { %p2664_p5 = pnand %p2662_p4, %p2648_p12  ;;  %p2670_p13 = scmp.lt.s32.totalorder %s2668_s13, %s2661_s15 }
  0x42   : > { %p2665_p0 = pneg %p2664_p5  ;;  %p2671_p7 = por %p2670_p13, %p2669_p6 }
  0x44   : > { %p2672_p3 = pnand %p2671_p7, %p2665_p0 }
  0x46   : > { %2675 = shalt.err (!%p2672_p3)
}
  0x47   : > { %s2750_s18 = smov 320   ;;  %s2751_s17 = smov 20  }
  0x48   : > { %2245 = dma.hbm_to_vmem [thread:$0]  (!%p3648_p11), %s2905_s7, 640, %s2900_s28, %s2907_s14, %s2750_s18, %s2750_s18, %s2751_s17  }
  0x49   : > { %p3649_p12 = scmp.ne.s32.totalorder %s3644_s11, 0 }
  0x4a   : > { %s2938_s19 = sand.u32 (!%p3649_p12), 1, %s2738_s22   ;;  %p3650_p1 = scmp.ne.s32.totalorder (!%p3649_p12), %s3641_s8, 0 }
  0x4b   : > { %245 = sbr.rel (%p3649_p12) target bundleno = 1761 (0x6e1), region = 44  ;;  %s248_s26 = scalar_lea.sflag (!%p3649_p12), [#allocation3], %s2938_s19 }
  0x4c   : > { %s2227_s20 = smul.u32 (!%p3649_p12), 40, %s2938_s19 }
  0x4e   : > { %s2942_s15 = scalar_lea.vmem (!%p3649_p12), [#allocation2], %s2227_s20 }
  0x52   : > { %2721 = dma.done.wait (%p3650_p1), %s248_s26, 640  }
  0x53   : > { %2723 = vsyncadd (%p3650_p1), %s248_s26, 4294966656  ;;  %p3651_p11 = scmp.eq.s32.totalorder %s2823_s25, 0 }
  0x55   : > { %2725 = dma.done.wait (%p3651_p11), [#allocation6], 512   ;;  %p3652_p8 = pmov %p3651_p11 }
  0x56   : > { %v2953_v0 = vld [vmem:[%s2942_s15] sm:$0xff]  ;;  %v2956_v1 = vld [vmem:[%s2942_s15 + $0x8] sm:$0xff]  ;;  %s2752_s8 = smov 108   ;;  %s2753_s11 = smov 127   ;;  %v296_v9 = vld [vmem:[%s2942_s15 + $0x10] sm:$0xf] }
  0x57   : > { %2727 = vsyncadd (%p3652_p8), [#allocation6], 4294966784  ;;  %v305_v2 = vcombine.low %v2956_v1, %v2956_v1  ;;  %v304_v3 = vcombine.low %v2953_v0, %v2953_v0  ;;  %v2964_v4 = vcombine.high %v2953_v0, %v2953_v0  ;;  %v2974_v8 = vcombine.high %v2956_v1, %v2956_v1  ;;  %s2754_s16 = smov 126   ;;  %s2755_s28 = smov 107  }
  0x58   : > { %v306_v11 = vcombine.low %v296_v9, %v296_v9  ;;  %s2756_s7 = smov 88   ;;  %s2757_s14 = smov 106   ;;  %v2759_v12 = vmov 0.0   ;;  %vm317_vm0 = vcmask 1039360   ;;  %vm336_vm1 = vcmask 1031168  }
  0x59   : > { %v2313_v5 = vpack.i.bf16 %v305_v2, %v2953_v0  ;;  %v2318_v6 = vpack.i.bf16 %v2956_v1, %v304_v3  ;;  %v2308_v7 = vpack.i.bf16 %v2956_v1, %v2964_v4  ;;  %v2323_v10 = vpack.i.bf16 %v2974_v8, %v2953_v0  ;;  %s2758_s29 = smov 87   ;;  %548 = vmatprep.mubr.f32.mxu0 %v2759_v12  ;;  %s2760_s12 = smov 86  }
  0x5a   : > { %619 = vmatprep.mubr.f32.mxu1 %v2759_v12  ;;  %vm355_vm2 = vcmask 883712   ;;  %vm455_vm3 = vcmask 1043456   ;;  %vm393_vm4 = vcmask 867328   ;;  %vm374_vm5 = vcmask 875520   ;;  %p3653_p10 = scmp.ne.s32.totalorder %s3642_s9, 0  ;;  %s2764_s17 = smov [#allocation7]  }
  0x5b   : > { %2314 = vrot.lane.b32.xlu1 %v2313_v5, %s2752_s8  ;;  %2304 = vrot.lane.b32.xlu0 %v2313_v5, %s2753_s11  ;;  %vm412_vm6 = vcmask 719872   ;;  %vm431_vm7 = vcmask 711680   ;;  %vm450_vm8 = vcmask 703488   ;;  %vm472_vm9 = vcmask 293888   ;;  %s2680_s20 = sshll.u32 %s2764_s17, 4  ;;  %s2681_s20 = int_to_ptr.vmem [resolvable:$false] %s2680_s20 }
  0x5c   : > { %vm2762_vm10 = vmmov 0   ;;  %vm742_vm11 = vcmask 588800   ;;  %vm970_vm15 = vcmask 64512   ;;  %s2682_s26 = scalar_lea.vmem %s2681_s20, 768 }
  0x5f   : > { %2319 = vrot.lane.b32.xlu1 %v2318_v6, %s2753_s11  ;;  %2309 = vrot.lane.b32.xlu0 %v2308_v7, %s2754_s16 }
  0x63   : > { %2324 = vrot.lane.b32.xlu1 %v2323_v10, %s2754_s16  ;;  %315 = vrot.lane.b32.xlu0 %v306_v11, %s2753_s11 }
  0x67   : > { %2329 = vrot.lane.b32.xlu1 %v2318_v6, %s2752_s8  ;;  %334 = vrot.lane.b32.xlu0 %v296_v9, %s2754_s16 }
  0x6b   : > { %2334 = vrot.lane.b32.xlu1 %v2308_v7, %s2755_s28  ;;  %353 = vrot.lane.b32.xlu0 %v306_v11, %s2752_s8 }
  0x6f   : > { %2344 = vrot.lane.b32.xlu1 %v2308_v7, %s2756_s7  ;;  %2339 = vrot.lane.b32.xlu0 %v2313_v5, %s2757_s14 }
  0x73   : > { %2354 = vrot.lane.b32.xlu1 %v2323_v10, %s2755_s28  ;;  %2349 = vrot.lane.b32.xlu0 %v2313_v5, %s2758_s29 }
  0x77   : > { %2359 = vrot.lane.b32.xlu1 %v2318_v6, %s2757_s14  ;;  %372 = vrot.lane.b32.xlu0 %v296_v9, %s2755_s28 }
  0x7b   : > { %2364 = vrot.lane.b32.xlu1 %v2323_v10, %s2756_s7  ;;  %391 = vrot.lane.b32.xlu0 %v306_v11, %s2757_s14 }
  0x7f   : > { %2369 = vrot.lane.b32.xlu1 %v2318_v6, %s2758_s29  ;;  %410 = vrot.lane.b32.xlu0 %v296_v9, %s2756_s7 }
  0x83   : > { %442 = vrot.lane.b32.xlu1 %v2964_v4, %s2760_s12  ;;  %429 = vrot.lane.b32.xlu0 %v306_v11, %s2758_s29 }
  0x87   : > { %440 = vrot.lane.b32.xlu1 %v2953_v0, %s2760_s12  ;;  %444 = vrot.lane.b32.xlu0 %v2956_v1, %s2760_s12 }
  0x8b   : > { %448 = vrot.lane.b32.xlu1 %v296_v9, %s2760_s12  ;;  %446 = vrot.lane.b32.xlu0 %v2974_v8, %s2760_s12 }
  0xcd   : > { %v2315_v13 = vpop.permute.xlu1 %2314  ;;  %v2305_v14 = vpop.permute.xlu0 %2304 }
  0xce   : > { %v2307_v15 = vunpack.i.h.bf16 %v2305_v14  ;;  %v2306_v16 = vunpack.i.l.bf16 %v2305_v14  ;;  %v2317_v17 = vunpack.i.h.bf16 %v2315_v13  ;;  %v2316_v18 = vunpack.i.l.bf16 %v2315_v13 }
  0xd0   : > { %v319_v23 = vsel %vm317_vm0, %v2306_v16, %v2307_v15  ;;  %v357_v25 = vsel %vm355_vm2, %v2316_v18, %v2317_v17 }
  0xd1   : > { %v2320_v19 = vpop.permute.xlu1 %2319  ;;  %v2310_v20 = vpop.permute.xlu0 %2309  ;;  %v457_v28 = vsel %vm455_vm3, %v2964_v4, %v319_v23 }
  0xd2   : > { %v2312_v21 = vunpack.i.h.bf16 %v2310_v20  ;;  %v2311_v22 = vunpack.i.l.bf16 %v2310_v20  ;;  %v2321_v30 = vunpack.i.l.bf16 %v2320_v19  ;;  %v2322_v33 = vunpack.i.h.bf16 %v2320_v19 }
  0xd4   : > { %v338_v24 = vsel %vm336_vm1, %v2311_v22, %v2312_v21  ;;  %v318_v39 = vsel %vm317_vm0, %v2321_v30, %v2306_v16  ;;  %v320_v48 = vsel %vm317_vm0, %v2307_v15, %v2322_v33 }
  0xd5   : > { %v2325_v26 = vpop.permute.xlu1 %2324  ;;  %v316_v27 = vpop.permute.xlu0 %315  ;;  %v461_v29 = vsel %vm455_vm3, %v338_v24, %v357_v25  ;;  %v456_v46 = vsel %vm455_vm3, %v2953_v0, %v318_v39  ;;  %v458_v57 = vsel %vm455_vm3, %v2956_v1, %v320_v48 }
  0xd6   : > { %v2137_v31 = vpack.c.bf16 %v461_v29, %v457_v28  ;;  %v2326_v32 = vunpack.i.l.bf16 %v2325_v26  ;;  %v2327_v34 = vunpack.i.h.bf16 %v2325_v26  ;;  %v321_v40 = vsel %vm317_vm0, %v2322_v33, %v316_v27 }
  0xd7   : > { %v459_v54 = vsel %vm455_vm3, %v2974_v8, %v321_v40 }
  0xd8   : > { %2138 = vmatprep.subr.bf16.mxu0 %v2137_v31  ;;  %v337_v41 = vsel %vm336_vm1, %v2326_v32, %v2311_v22  ;;  %v339_v49 = vsel %vm336_vm1, %v2312_v21, %v2327_v34 }
  0xd9   : > { %v2330_v35 = vpop.permute.xlu1 %2329  ;;  %v335_v36 = vpop.permute.xlu0 %334 }
  0xda   : > { %v2332_v37 = vunpack.i.h.bf16 %v2330_v35  ;;  %v2331_v38 = vunpack.i.l.bf16 %v2330_v35  ;;  %v340_v50 = vsel %vm336_vm1, %v2327_v34, %v335_v36 }
  0xdc   : > { %v356_v42 = vsel %vm355_vm2, %v2331_v38, %v2316_v18  ;;  %v358_v43 = vsel %vm355_vm2, %v2317_v17, %v2332_v37 }
  0xdd   : > { %v3020_v44 = vpop.permute.xlu1 %2334  ;;  %v354_v45 = vpop.permute.xlu0 %353  ;;  %v460_v47 = vsel %vm455_vm3, %v337_v41, %v356_v42  ;;  %v462_v53 = vsel %vm455_vm3, %v339_v49, %v358_v43 }
  0xde   : > { %v359_v51 = vsel %vm355_vm2, %v2332_v37, %v354_v45  ;;  %v2139_v52 = vpack.c.bf16 %v460_v47, %v456_v46  ;;  %v2147_v60 = vpack.c.bf16 %v462_v53, %v458_v57  ;;  %v2337_v63 = vunpack.i.h.bf16 %v3020_v44 }
  0xdf   : > { %v463_v55 = vsel %vm455_vm3, %v340_v50, %v359_v51  ;;  %v2336_v0 = vunpack.i.l.bf16 %v3020_v44 }
  0xe0   : > { %2140 = vmatpush1.bf16.msra.mxu0 %v2139_v52  ;;  %v2145_v56 = vpack.c.bf16 %v463_v55, %v459_v54 }
  0xe1   : > { %v2345_v58 = vpop.permute.xlu1 %2344  ;;  %v2340_v59 = vpop.permute.xlu0 %2339  ;;  %v376_v8 = vsel %vm374_vm5, %v2336_v0, %v2337_v63 }
  0xe2   : > { %v2342_v61 = vunpack.i.h.bf16 %v2340_v59  ;;  %v2341_v62 = vunpack.i.l.bf16 %v2340_v59  ;;  %2146 = vmatprep.subr.bf16.mxu1 %v2145_v56  ;;  %v2347_v2 = vunpack.i.h.bf16 %v2345_v58  ;;  %v2346_v3 = vunpack.i.l.bf16 %v2345_v58  ;;  %v3066_v56 = vld [vmem:[%s3629_s1] sm:$0xff] }
  0xe3   : > { %2148 = vmatpush1.bf16.msra.mxu1 %v2147_v60 }
  0xe4   : > { %v395_v1 = vsel %vm393_vm4, %v2341_v62, %v2342_v61  ;;  %v414_v9 = vsel %vm412_vm6, %v2346_v3, %v2347_v2 }
  0xe5   : > { %v2355_v4 = vpop.permute.xlu1 %2354  ;;  %v2350_v5 = vpop.permute.xlu0 %2349  ;;  %v465_v14 = vsel %vm455_vm3, %v376_v8, %v395_v1 }
  0xe6   : > { %v2352_v6 = vunpack.i.h.bf16 %v2350_v5  ;;  %v2351_v7 = vunpack.i.l.bf16 %v2350_v5  ;;  %v2356_v20 = vunpack.i.l.bf16 %v2355_v4  ;;  %v2357_v22 = vunpack.i.h.bf16 %v2355_v4  ;;  %v3089_v5 = vld [vmem:[#allocation5 + $0x18] sm:$0xff] }
  0xe8   : > { %v433_v10 = vsel %vm431_vm7, %v2351_v7, %v2352_v6  ;;  %v375_v30 = vsel %vm374_vm5, %v2356_v20, %v2336_v0  ;;  %v377_v46 = vsel %vm374_vm5, %v2337_v63, %v2357_v22  ;;  %v3081_v63 = vld [vmem:[#allocation5] sm:$0xff] }
  0xe9   : > { %v2360_v11 = vpop.permute.xlu1 %2359  ;;  %v373_v13 = vpop.permute.xlu0 %372  ;;  %v469_v15 = vsel %vm455_vm3, %v414_v9, %v433_v10 }
  0xea   : > { %v2141_v16 = vpack.c.bf16 %v469_v15, %v465_v14  ;;  %v2361_v19 = vunpack.i.l.bf16 %v2360_v11  ;;  %v2362_v23 = vunpack.i.h.bf16 %v2360_v11  ;;  %v378_v31 = vsel %vm374_vm5, %v2357_v22, %v373_v13  ;;  %v3118_v13 = vld [vmem:[%s2942_s15 + $0x14] sm:$0xff]  ;;  %v3121_v14 = vld [vmem:[%s2942_s15 + $0x1c] sm:$0xff]  ;;  %v2043_v22 = vld [vmem:[%s2942_s15 + $0x24] sm:$0xf] }
  0xeb   : > { %v1133_v15 = vcombine.low %v3121_v14, %v3121_v14 }
  0xec   : > { %2142 = vmatprep.subr.bf16.mxu0 %v2141_v16  ;;  %v394_v27 = vsel %vm393_vm4, %v2361_v19, %v2341_v62  ;;  %v396_v36 = vsel %vm393_vm4, %v2342_v61, %v2362_v23  ;;  %v3079_v62 = vld [vmem:[#allocation5 + $0x8] sm:$0xff]  ;;  %v3131_v16 = vcombine.high %v3118_v13, %v3118_v13  ;;  %v1132_v19 = vcombine.low %v3118_v13, %v3118_v13 }
  0xed   : > { %v2365_v17 = vpop.permute.xlu1 %2364  ;;  %v392_v18 = vpop.permute.xlu0 %391  ;;  %v464_v40 = vsel %vm455_vm3, %v375_v30, %v394_v27  ;;  %v466_v50 = vsel %vm455_vm3, %v377_v46, %v396_v36 }
  0xee   : > { %v2366_v21 = vunpack.i.l.bf16 %v2365_v17  ;;  %v2367_v24 = vunpack.i.h.bf16 %v2365_v17  ;;  %v397_v33 = vsel %vm393_vm4, %v2362_v23, %v392_v18  ;;  %v2443_v17 = vpack.i.bf16 %v1133_v15, %v3118_v13 }
  0xef   : > { %v467_v47 = vsel %vm455_vm3, %v378_v31, %v397_v33  ;;  %v2448_v18 = vpack.i.bf16 %v3121_v14, %v3131_v16  ;;  %v2458_v20 = vpack.i.bf16 %v3121_v14, %v1132_v19  ;;  %v1134_v23 = vcombine.low %v2043_v22, %v2043_v22 }
  0xf0   : > { %v413_v32 = vsel %vm412_vm6, %v2366_v21, %v2346_v3  ;;  %v415_v37 = vsel %vm412_vm6, %v2347_v2, %v2367_v24  ;;  %v3083_v2 = vld [vmem:[#allocation5 + $0x10] sm:$0xff]  ;;  %v2761_v3 = vmov 0.0|0.0   ;;  %v3146_v21 = vcombine.high %v3121_v14, %v3121_v14 }
  0xf1   : > { %v2370_v25 = vpop.permute.xlu1 %2369  ;;  %v411_v26 = vpop.permute.xlu0 %410 }
  0xf2   : > { %v2372_v28 = vunpack.i.h.bf16 %v2370_v25  ;;  %v2371_v29 = vunpack.i.l.bf16 %v2370_v25  ;;  %v416_v42 = vsel %vm412_vm6, %v2367_v24, %v411_v26  ;;  %v2463_v24 = vpack.i.bf16 %v3146_v21, %v3118_v13 }
  0xf4   : > { %v432_v34 = vsel %vm431_vm7, %v2371_v29, %v2351_v7  ;;  %v434_v35 = vsel %vm431_vm7, %v2352_v6, %v2372_v28 }
  0xf5   : > { %v443_v38 = vpop.permute.xlu1 %442  ;;  %v430_v39 = vpop.permute.xlu0 %429  ;;  %v468_v41 = vsel %vm455_vm3, %v413_v32, %v432_v34  ;;  %v470_v45 = vsel %vm455_vm3, %v415_v37, %v434_v35 }
  0xf6   : > { %v435_v43 = vsel %vm431_vm7, %v2372_v28, %v430_v39  ;;  %v2143_v44 = vpack.c.bf16 %v468_v41, %v464_v40  ;;  %v2151_v53 = vpack.c.bf16 %v470_v45, %v466_v50 }
  0xf7   : > { %v471_v48 = vsel %vm455_vm3, %v416_v42, %v435_v43 }
  0xf8   : > { %2144 = vmatpush1.bf16.msra.mxu0 %v2143_v44  ;;  %v2149_v49 = vpack.c.bf16 %v471_v48, %v467_v47 }
  0xf9   : > { %v441_v51 = vpop.permute.xlu1 %440  ;;  %v445_v52 = vpop.permute.xlu0 %444 }
  0xfa   : > { %v451_v54 = vsel %vm450_vm8, %v441_v51, %v443_v38  ;;  %v452_v55 = vsel %vm450_vm8, %v443_v38, %v445_v52  ;;  %2150 = vmatprep.subr.bf16.mxu1 %v2149_v49 }
  0xfb   : > { %2031 = vmatprep.subr.msk.mxu0 %vm455_vm3, %v452_v55  ;;  %2152 = vmatpush1.bf16.msra.mxu1 %v2151_v53 }
  0xfc   : > { %2032 = vmatpush1.msk.msra.mxu0 %vm455_vm3, %v451_v54 }
  0xfd   : > { %v449_v57 = vpop.permute.xlu1 %448  ;;  %v447_v58 = vpop.permute.xlu0 %446  ;;  %2033 = vmatmul.mubr.msk.f32.vlgmr.msra.gmra.mrb[0].mxu0 %vm472_vm9, %v3066_v56 }
  0xfe   : > { %v453_v59 = vsel %vm450_vm8, %v445_v52, %v447_v58  ;;  %v454_v60 = vsel %vm450_vm8, %v447_v58, %v449_v57  ;;  %810 = vmatprep.mubr.f32.mxu0 %v2759_v12 }
  0xff   : > { %2034 = vmatprep.subr.msk.mxu1 %vm455_vm3, %v454_v60 }
 0x100   : > { %2035 = vmatpush1.msk.msra.mxu1 %vm455_vm3, %v453_v59 }
 0x101   : > { %2036 = vmatmul.mubr.msk.f32.vlgmr.msra.gmra.mrb[0].mxu1 %vm472_vm9, %v3066_v56  ;;  %2169 = vmatprep.subr.bf16.mxu1 %v2761_v3 }
 0x102   : > { %2103 = vmatprep.mubr.msk.f32.mxu1 %vm2762_vm10, %v2759_v12 }
 0x1d0   : > { %v550_v61 = vpop.f32.mrb[0].mxu0 }
 0x1d1   : > { %v552_v0 = vpop.f32.mrb[1].mxu0  ;;  %v3092_v1 = vadd.f32 %v550_v61, %v3081_v63 }
 0x1d2   : > { %v3087_v4 = vadd.f32 %v552_v0, %v3079_v62 }
 0x1d4   : > { %v621_v6 = vpop.f32.mrb[0].mxu1 }
 0x1d5   : > { %v3095_v7 = vadd.f32 %v621_v6, %v3083_v2  ;;  %v623_v8 = vpop.f32.mrb[1].mxu1 }
 0x1d6   : > { %v624_v9 = vadd.f32 %v623_v8, %v3089_v5 }
 0x1d7   : > { %v2373_v10 = vpack.i.bf16 %v3095_v7, %v3087_v4 }
 0x1d8   : > { %v2378_v11 = vpack.i.bf16 %v624_v9, %v3092_v1 }
 0x1d9   : > { %2374 = vrot.lane.b32.xlu0 %v2373_v10, %s2753_s11 }
 0x1da   : > { %2379 = vrot.lane.b32.xlu1 %v2378_v11, %s2753_s11 }
 0x1dd   : > { %2384 = vrot.lane.b32.xlu0 %v2373_v10, %s2754_s16 }
 0x1de   : > { %2389 = vrot.lane.b32.xlu1 %v2373_v10, %s2752_s8 }
 0x1e1   : > { %2394 = vrot.lane.b32.xlu0 %v2378_v11, %s2754_s16 }
 0x1e2   : > { %2399 = vrot.lane.b32.xlu1 %v2378_v11, %s2752_s8 }
 0x1e5   : > { %2404 = vrot.lane.b32.xlu0 %v2373_v10, %s2755_s28 }
 0x1e6   : > { %2409 = vrot.lane.b32.xlu1 %v2373_v10, %s2757_s14 }
 0x1e9   : > { %2414 = vrot.lane.b32.xlu0 %v2378_v11, %s2755_s28 }
 0x1ea   : > { %2419 = vrot.lane.b32.xlu1 %v2378_v11, %s2757_s14 }
 0x1ed   : > { %2424 = vrot.lane.b32.xlu0 %v2373_v10, %s2756_s7 }
 0x1ee   : > { %2429 = vrot.lane.b32.xlu1 %v2373_v10, %s2758_s29 }
 0x1f1   : > { %2434 = vrot.lane.b32.xlu0 %v2378_v11, %s2756_s7 }
 0x1f2   : > { %2439 = vrot.lane.b32.xlu1 %v2378_v11, %s2758_s29 }
 0x1f5   : > { %730 = vrot.lane.b32.xlu0 %v3087_v4, %s2760_s12 }
 0x1f6   : > { %732 = vrot.lane.b32.xlu1 %v3095_v7, %s2760_s12 }
 0x1f9   : > { %728 = vrot.lane.b32.xlu0 %v3092_v1, %s2760_s12 }
 0x1fa   : > { %734 = vrot.lane.b32.xlu1 %v624_v9, %s2760_s12 }
 0x1fd   : > { %2444 = vrot.lane.b32.xlu0 %v2443_v17, %s2753_s11 }
 0x1fe   : > { %2449 = vrot.lane.b32.xlu1 %v2448_v18, %s2754_s16 }
 0x201   : > { %2454 = vrot.lane.b32.xlu0 %v2443_v17, %s2752_s8 }
 0x202   : > { %2459 = vrot.lane.b32.xlu1 %v2458_v20, %s2753_s11 }
 0x205   : > { %1143 = vrot.lane.b32.xlu0 %v1134_v23, %s2753_s11 }
 0x206   : > { %2464 = vrot.lane.b32.xlu1 %v2463_v24, %s2754_s16 }
 0x209   : > { %1161 = vrot.lane.b32.xlu0 %v2043_v22, %s2754_s16 }
 0x20a   : > { %2469 = vrot.lane.b32.xlu1 %v2458_v20, %s2752_s8 }
 0x20d   : > { %1179 = vrot.lane.b32.xlu0 %v1134_v23, %s2752_s8 }
 0x20e   : > { %2474 = vrot.lane.b32.xlu1 %v2448_v18, %s2755_s28 }
 0x211   : > { %2479 = vrot.lane.b32.xlu0 %v2443_v17, %s2757_s14 }
 0x212   : > { %2484 = vrot.lane.b32.xlu1 %v2448_v18, %s2756_s7 }
 0x215   : > { %2489 = vrot.lane.b32.xlu0 %v2443_v17, %s2758_s29 }
 0x216   : > { %2494 = vrot.lane.b32.xlu1 %v2463_v24, %s2755_s28 }
 0x219   : > { %1197 = vrot.lane.b32.xlu0 %v2043_v22, %s2755_s28 }
 0x21a   : > { %2499 = vrot.lane.b32.xlu1 %v2458_v20, %s2757_s14 }
 0x21d   : > { %1215 = vrot.lane.b32.xlu0 %v1134_v23, %s2757_s14 }
 0x21e   : > { %2504 = vrot.lane.b32.xlu1 %v2463_v24, %s2756_s7 }
 0x221   : > { %1233 = vrot.lane.b32.xlu0 %v2043_v22, %s2756_s7 }
 0x222   : > { %2509 = vrot.lane.b32.xlu1 %v2458_v20, %s2758_s29 }
 0x225   : > { %1251 = vrot.lane.b32.xlu0 %v1134_v23, %s2758_s29 }
 0x226   : > { %1263 = vrot.lane.b32.xlu1 %v3131_v16, %s2760_s12 }
 0x229   : > { %1265 = vrot.lane.b32.xlu0 %v3121_v14, %s2760_s12 }
 0x22a   : > { %1261 = vrot.lane.b32.xlu1 %v3118_v13, %s2760_s12 }
 0x22d   : > { %1267 = vrot.lane.b32.xlu0 %v3146_v21, %s2760_s12 }
 0x22e   : > { %1269 = vrot.lane.b32.xlu1 %v2043_v22, %s2760_s12 }
 0x24b   : > { %v2375_v25 = vpop.permute.xlu0 %2374 }
 0x24c   : > { %v2377_v26 = vunpack.i.h.bf16 %v2375_v25  ;;  %v2376_v27 = vunpack.i.l.bf16 %v2375_v25  ;;  %v2380_v28 = vpop.permute.xlu1 %2379 }
 0x24d   : > { %v2382_v29 = vunpack.i.h.bf16 %v2380_v28  ;;  %v2381_v30 = vunpack.i.l.bf16 %v2380_v28 }
 0x24e   : > { %v639_v31 = vsel %vm317_vm0, %v2376_v27, %v2377_v26 }
 0x24f   : > { %v640_v32 = vsel %vm317_vm0, %v2377_v26, %v2382_v29  ;;  %v638_v33 = vsel %vm317_vm0, %v2381_v30, %v2376_v27  ;;  %v2385_v34 = vpop.permute.xlu0 %2384  ;;  %v2153_v35 = vpack.c.bf16 %v639_v31, %v3087_v4 }
 0x250   : > { %v2170_v36 = vpack.c.bf16 %v640_v32, %v3095_v7  ;;  %v2155_v37 = vpack.c.bf16 %v638_v33, %v3092_v1  ;;  %v2387_v38 = vunpack.i.h.bf16 %v2385_v34  ;;  %v2386_v39 = vunpack.i.l.bf16 %v2385_v34  ;;  %v2390_v40 = vpop.permute.xlu1 %2389 }
 0x251   : > { %v2392_v41 = vunpack.i.h.bf16 %v2390_v40  ;;  %v2391_v42 = vunpack.i.l.bf16 %v2390_v40  ;;  %2154 = vmatprep.subr.bf16.mxu0 %v2153_v35 }
 0x252   : > { %2156 = vmatpush1.bf16.msra.mxu0 %v2155_v37  ;;  %2171 = vmatpush3.bf16.msra.mxu1 %v2170_v36  ;;  %v653_v43 = vsel %vm336_vm1, %v2386_v39, %v2387_v38 }
 0x253   : > { %v2395_v44 = vpop.permute.xlu0 %2394  ;;  %v667_v45 = vsel %vm355_vm2, %v2391_v42, %v2392_v41  ;;  %2172 = vmatprep.subr.bf16.mxu1 %v2761_v3 }
 0x254   : > { %v2397_v46 = vunpack.i.h.bf16 %v2395_v44  ;;  %v2396_v47 = vunpack.i.l.bf16 %v2395_v44  ;;  %v2400_v48 = vpop.permute.xlu1 %2399  ;;  %v2157_v49 = vpack.c.bf16 %v667_v45, %v653_v43 }
 0x255   : > { %v2402_v50 = vunpack.i.h.bf16 %v2400_v48  ;;  %v2401_v51 = vunpack.i.l.bf16 %v2400_v48 }
 0x256   : > { %v654_v52 = vsel %vm336_vm1, %v2387_v38, %v2397_v46  ;;  %v652_v53 = vsel %vm336_vm1, %v2396_v47, %v2386_v39  ;;  %2158 = vmatprep.subr.bf16.mxu0 %v2157_v49 }
 0x257   : > { %v666_v54 = vsel %vm355_vm2, %v2401_v51, %v2391_v42  ;;  %v668_v55 = vsel %vm355_vm2, %v2392_v41, %v2402_v50  ;;  %v2405_v57 = vpop.permute.xlu0 %2404 }
 0x258   : > { %v2159_v58 = vpack.c.bf16 %v666_v54, %v652_v53  ;;  %v2173_v59 = vpack.c.bf16 %v668_v55, %v654_v52  ;;  %v2407_v60 = vunpack.i.h.bf16 %v2405_v57  ;;  %v2406_v61 = vunpack.i.l.bf16 %v2405_v57  ;;  %v2410_v0 = vpop.permute.xlu1 %2409  ;;  %v3212_v53 = vld [vmem:[%s3631_s3] sm:$0xff] }
 0x259   : > { %v2412_v4 = vunpack.i.h.bf16 %v2410_v0  ;;  %v2411_v1 = vunpack.i.l.bf16 %v2410_v0 }
 0x25a   : > { %2160 = vmatpush1.bf16.msra.mxu0 %v2159_v58  ;;  %2174 = vmatpush3.bf16.msra.mxu1 %v2173_v59  ;;  %v681_v6 = vsel %vm374_vm5, %v2406_v61, %v2407_v60 }
 0x25b   : > { %v2415_v7 = vpop.permute.xlu0 %2414  ;;  %v695_v8 = vsel %vm393_vm4, %v2411_v1, %v2412_v4  ;;  %2175 = vmatprep.subr.bf16.mxu1 %v2761_v3 }
 0x25c   : > { %v2417_v9 = vunpack.i.h.bf16 %v2415_v7  ;;  %v2416_v10 = vunpack.i.l.bf16 %v2415_v7  ;;  %v2420_v11 = vpop.permute.xlu1 %2419  ;;  %v2161_v15 = vpack.c.bf16 %v695_v8, %v681_v6 }
 0x25d   : > { %v2422_v17 = vunpack.i.h.bf16 %v2420_v11  ;;  %v2421_v18 = vunpack.i.l.bf16 %v2420_v11 }
 0x25e   : > { %v680_v19 = vsel %vm374_vm5, %v2416_v10, %v2406_v61  ;;  %v682_v20 = vsel %vm374_vm5, %v2407_v60, %v2417_v9  ;;  %2162 = vmatprep.subr.bf16.mxu0 %v2161_v15 }
 0x25f   : > { %v694_v22 = vsel %vm393_vm4, %v2421_v18, %v2411_v1  ;;  %v696_v23 = vsel %vm393_vm4, %v2412_v4, %v2422_v17  ;;  %v2425_v24 = vpop.permute.xlu0 %2424 }
 0x260   : > { %v2163_v25 = vpack.c.bf16 %v694_v22, %v680_v19  ;;  %v2176_v26 = vpack.c.bf16 %v696_v23, %v682_v20  ;;  %v2427_v27 = vunpack.i.h.bf16 %v2425_v24  ;;  %v2426_v28 = vunpack.i.l.bf16 %v2425_v24  ;;  %v2430_v29 = vpop.permute.xlu1 %2429 }
 0x261   : > { %v2432_v30 = vunpack.i.h.bf16 %v2430_v29  ;;  %v2431_v31 = vunpack.i.l.bf16 %v2430_v29 }
 0x262   : > { %2164 = vmatpush1.bf16.msra.mxu0 %v2163_v25  ;;  %2177 = vmatpush3.bf16.msra.mxu1 %v2176_v26  ;;  %v709_v32 = vsel %vm412_vm6, %v2426_v28, %v2427_v27 }
 0x263   : > { %v2435_v33 = vpop.permute.xlu0 %2434  ;;  %v723_v34 = vsel %vm431_vm7, %v2431_v31, %v2432_v30  ;;  %2178 = vmatprep.subr.bf16.mxu1 %v2761_v3 }
 0x264   : > { %v2437_v35 = vunpack.i.h.bf16 %v2435_v33  ;;  %v2436_v36 = vunpack.i.l.bf16 %v2435_v33  ;;  %v2440_v37 = vpop.permute.xlu1 %2439  ;;  %v2165_v38 = vpack.c.bf16 %v723_v34, %v709_v32 }
 0x265   : > { %v2442_v39 = vunpack.i.h.bf16 %v2440_v37  ;;  %v2441_v40 = vunpack.i.l.bf16 %v2440_v37 }
 0x266   : > { %v708_v41 = vsel %vm412_vm6, %v2436_v36, %v2426_v28  ;;  %v710_v42 = vsel %vm412_vm6, %v2427_v27, %v2437_v35  ;;  %2166 = vmatprep.subr.bf16.mxu0 %v2165_v38 }
 0x267   : > { %v722_v43 = vsel %vm431_vm7, %v2441_v40, %v2431_v31  ;;  %v724_v44 = vsel %vm431_vm7, %v2432_v30, %v2442_v39  ;;  %v731_v45 = vpop.permute.xlu0 %730 }
 0x268   : > { %v2167_v46 = vpack.c.bf16 %v722_v43, %v708_v41  ;;  %v2179_v47 = vpack.c.bf16 %v724_v44, %v710_v42  ;;  %v733_v48 = vpop.permute.xlu1 %732 }
 0x269   : > { %v737_v49 = vsel %vm450_vm8, %v731_v45, %v733_v48 }
 0x26a   : > { %2168 = vmatpush1.bf16.msra.mxu0 %v2167_v46  ;;  %2180 = vmatpush3.bf16.msra.mxu1 %v2179_v47 }
 0x26b   : > { %v729_v50 = vpop.permute.xlu0 %728  ;;  %762 = vmatprep.subr.mxu0 %v737_v49  ;;  %2101 = vmatprep.subr.mxu1 %v2759_v12 }
 0x26c   : > { %v736_v51 = vsel %vm450_vm8, %v729_v50, %v731_v45  ;;  %v735_v52 = vpop.permute.xlu1 %734 }
 0x26d   : > { %v738_v54 = vsel %vm450_vm8, %v733_v48, %v735_v52 }
 0x26e   : > { %763 = vmatpush1.msra.mxu0 %v736_v51  ;;  %2102 = vmatpush3.msra.mxu1 %v738_v54 }
 0x26f   : > { %2037 = vmatmul.mubr.msk.f32.vlgmr.msra.gmra.mrb[2].mxu0 %vm742_vm11, %v3212_v53  ;;  %2104 = vmatmul.mubr.msk.f32.vlgmr.msra.gmra.mrb[2].mxu1 %vm742_vm11, %v3212_v53  ;;  %v3223_v55 = vpop.permute.xlu0 %2444 }
 0x270   : > { %2106 = vmatprep.subr.mxu1 %v2759_v12  ;;  %2108 = vmatprep.mubr.msk.f32.mxu1 %vm2762_vm10, %v2759_v12  ;;  %v3225_v57 = vpop.permute.xlu1 %2449  ;;  %v2447_v33 = vunpack.i.h.bf16 %v3223_v55  ;;  %v2446_v34 = vunpack.i.l.bf16 %v3223_v55 }
 0x271   : > { %1038 = vmatprep.mubr.f32.mxu0 %v2759_v12  ;;  %v2452_v36 = vunpack.i.h.bf16 %v3225_v57  ;;  %v2451_v37 = vunpack.i.l.bf16 %v3225_v57 }
 0x272   : > { %v1146_v49 = vsel %vm317_vm0, %v2446_v34, %v2447_v33 }
 0x273   : > { %v3227_v58 = vpop.permute.xlu0 %2454  ;;  %v1164_v55 = vsel %vm336_vm1, %v2451_v37, %v2452_v36 }
 0x274   : > { %v3229_v59 = vpop.permute.xlu1 %2459  ;;  %v2457_v42 = vunpack.i.h.bf16 %v3227_v58  ;;  %v2456_v47 = vunpack.i.l.bf16 %v3227_v58 }
 0x275   : > { %v2462_v45 = vunpack.i.h.bf16 %v3229_v59  ;;  %v2461_v46 = vunpack.i.l.bf16 %v3229_v59 }
 0x277   : > { %v3231_v60 = vpop.permute.xlu0 %1143 }
 0x278   : > { %v3233_v61 = vpop.permute.xlu1 %2464 }
 0x279   : > { %v2467_v50 = vunpack.i.h.bf16 %v3233_v61  ;;  %v2466_v58 = vunpack.i.l.bf16 %v3233_v61 }
 0x27b   : > { %v3235_v0 = vpop.permute.xlu0 %1161 }
 0x27c   : > { %v3247_v8 = vpop.permute.xlu1 %2469 }
 0x27d   : > { %v2472_v52 = vunpack.i.h.bf16 %v3247_v8 }
 0x27f   : > { %v3256_v20 = vpop.permute.xlu0 %1179  ;;  %v1183_v61 = vsel %vm355_vm2, %v2457_v42, %v2472_v52 }
 0x280   : > { %v3259_v25 = vpop.permute.xlu1 %2474 }
 0x283   : > { %v3261_v28 = vpop.permute.xlu0 %2479 }
 0x284   : > { %v3263_v29 = vpop.permute.xlu1 %2484 }
 0x287   : > { %v3265_v32 = vpop.permute.xlu0 %2489 }
 0x288   : > { %v3273_v40 = vpop.permute.xlu1 %2494 }
 0x342   : > { %v3237_v4 = vpop.f32.mrb[2].mxu0  ;;  %v3239_v1 = vpop.f32.mrb[2].mxu1 }
 0x343   : > { %v3242_v6 = vmul.f32 0.70710677, %v3237_v4  ;;  %v3245_v7 = vmul.f32 0.70710677, %v3239_v1  ;;  %v3249_v9 = vpop.f32.mrb[3].mxu0  ;;  %v2105_v10 = vpop.f32.mrb[3].mxu1 }
 0x344   : > { %v3254_v17 = vmul.f32 0.70710677, %v3249_v9 }
 0x345   : > { %v893_v11 = vand.u32 2147483647, %v3242_v6  ;;  %v895_v15 = vand.u32 2147483647, %v3245_v7  ;;  %vm950_vm12 = vcmp.lt.f32.partialorder %v3242_v6, 0.0  ;;  %vm952_vm13 = vcmp.lt.f32.partialorder %v3245_v7, 0.0 }
 0x346   : > { %v894_v22 = vand.u32 2147483647, %v3254_v17  ;;  %vm951_vm14 = vcmp.lt.f32.partialorder %v3254_v17, 0.0 }
 0x347   : > { %v896_v18 = vmul.f32 0.3275911, %v893_v11  ;;  %v898_v19 = vmul.f32 0.3275911, %v895_v15  ;;  %v932_v30 = vsub.f32 0.0, %v893_v11  ;;  %v934_v31 = vsub.f32 0.0, %v895_v15 }
 0x348   : > { %v897_v26 = vmul.f32 0.3275911, %v894_v22  ;;  %v933_v39 = vsub.f32 0.0, %v894_v22 }
 0x349   : > { %v899_v23 = vadd.f32 1.0, %v896_v18  ;;  %v901_v24 = vadd.f32 1.0, %v898_v19  ;;  %v935_v38 = vmul.f32 %v932_v30, %v893_v11  ;;  %v937_v44 = vmul.f32 %v934_v31, %v895_v15  ;;  %v3289_v15 = vpop.permute.xlu0 %1197  ;;  %v3298_v30 = vpop.permute.xlu1 %2499 }
 0x34a   : > { %v900_v27 = vadd.f32 1.0, %v897_v26  ;;  %v936_v11 = vmul.f32 %v933_v39, %v894_v22  ;;  %v1182_v26 = vsel %vm355_vm2, %v2456_v47, %v2457_v42  ;;  %v1165_v22 = vsel %vm336_vm1, %v2452_v36, %v2467_v50 }
 0x34b   : > { %2594 = vrcp.f32 %v899_v23  ;;  %v938_v57 = vmul.f32 1.442695, %v935_v38  ;;  %v942_v18 = vmul.f32 1.442695, %v937_v44  ;;  %v1145_v23 = vsel %vm317_vm0, %v2461_v46, %v2446_v34 }
 0x34c   : > { %2596 = vrcp.f32 %v901_v24  ;;  %v1147_v24 = vsel %vm317_vm0, %v2447_v33, %v2462_v45  ;;  %v940_v44 = vmul.f32 1.442695, %v936_v11  ;;  %v1163_v34 = vsel %vm336_vm1, %v2466_v58, %v2451_v37 }
 0x34d   : > { %2598 = vrcp.f32 %v900_v27  ;;  %v1148_v36 = vsel %vm317_vm0, %v2462_v45, %v3231_v60  ;;  %v3313_v42 = vsel %vm455_vm3, %v3121_v14, %v1147_v24  ;;  %v1184_v11 = vsel %vm355_vm2, %v2472_v52, %v3256_v20  ;;  %v3323_v45 = vpop.permute.xlu1 %2504 }
 0x34e   : > { %2600 = vpow2.f32 %v938_v57  ;;  %v3327_v14 = vsel %vm455_vm3, %v3131_v16, %v1146_v49  ;;  %v2477_v52 = vunpack.i.h.bf16 %v3259_v25  ;;  %v2476_v24 = vunpack.i.l.bf16 %v3259_v25 }
 0x34f   : > { %2602 = vpow2.f32 %v942_v18 }
 0x350   : > { %2604 = vpow2.f32 %v940_v44 }
 0x355   : > { %v3269_v35 = vpop.eup %2594 }
 0x356   : > { %v3275_v41 = vpop.eup %2596  ;;  %v905_v43 = vmul.f32 1.0614054, %v3269_v35 }
 0x357   : > { %v907_v48 = vmul.f32 1.0614054, %v3275_v41  ;;  %v3286_v54 = vpop.eup %2598 }
 0x358   : > { %v908_v51 = vadd.f32 -1.4531521, %v905_v43  ;;  %v906_v19 = vmul.f32 1.0614054, %v3286_v54  ;;  %v2471_v43 = vunpack.i.l.bf16 %v3247_v8  ;;  %v3316_v8 = vsel %vm455_vm3, %v1165_v22, %v1183_v61  ;;  %v2601_v44 = vpop.eup %2600 }
 0x359   : > { %v910_v10 = vadd.f32 -1.4531521, %v907_v48 }
 0x35a   : > { %v911_v59 = vmul.f32 %v3269_v35, %v908_v51  ;;  %v909_v38 = vadd.f32 -1.4531521, %v906_v19  ;;  %v3309_v51 = vpop.permute.xlu0 %1215  ;;  %v1181_v60 = vsel %vm355_vm2, %v2471_v43, %v2456_v47  ;;  %v3339_v47 = vsel %vm455_vm3, %v3146_v21, %v1148_v36 }
 0x35b   : > { %v913_v27 = vmul.f32 %v3275_v41, %v910_v10  ;;  %v1166_v10 = vsel %vm336_vm1, %v2467_v50, %v3235_v0  ;;  %v2191_v0 = vpack.c.bf16 %v3316_v8, %v3313_v42  ;;  %v3334_v50 = vsel %vm455_vm3, %v1164_v55, %v1182_v26 }
 0x35c   : > { %v914_v31 = vadd.f32 1.4214138, %v911_v59  ;;  %v912_v46 = vmul.f32 %v3286_v54, %v909_v38  ;;  %v3343_v16 = vsel %vm455_vm3, %v1166_v10, %v1184_v11  ;;  %v2486_v55 = vunpack.i.l.bf16 %v3263_v29 }
 0x35d   : > { %v916_v39 = vadd.f32 1.4214138, %v913_v27  ;;  %v2487_v27 = vunpack.i.h.bf16 %v3263_v29  ;;  %v2497_v26 = vunpack.i.h.bf16 %v3273_v40  ;;  %v2481_v43 = vunpack.i.l.bf16 %v3261_v28 }
 0x35e   : > { %v917_v33 = vmul.f32 %v3269_v35, %v914_v31  ;;  %v915_v57 = vadd.f32 1.4214138, %v912_v46  ;;  %v2496_v31 = vunpack.i.l.bf16 %v3273_v40  ;;  %v1234_v21 = vpop.permute.xlu0 %1233  ;;  %v3356_v46 = vpop.permute.xlu1 %2509  ;;  %v3363_v40 = vsel %vm455_vm3, %v1163_v34, %v1181_v60 }
 0x35f   : > { %v919_v48 = vmul.f32 %v3275_v41, %v916_v39  ;;  %v2482_v39 = vunpack.i.h.bf16 %v3261_v28  ;;  %v2189_v28 = vpack.c.bf16 %v3343_v16, %v3339_v47  ;;  %v3371_v10 = vsel %vm412_vm6, %v2486_v55, %v2487_v27 }
 0x360   : > { %v920_v37 = vadd.f32 -0.28449672, %v917_v33  ;;  %v918_v18 = vmul.f32 %v3286_v54, %v915_v57  ;;  %v2502_v33 = vunpack.i.h.bf16 %v3298_v30  ;;  %v1200_v57 = vsel %vm374_vm5, %v2476_v24, %v2477_v52 }
 0x361   : > { %v922_v58 = vadd.f32 -0.28449672, %v919_v48  ;;  %v3360_v48 = vsel %vm455_vm3, %v3118_v13, %v1145_v23  ;;  %v3374_v13 = vsel %vm374_vm5, %v2496_v31, %v2476_v24  ;;  %v2501_v23 = vunpack.i.l.bf16 %v3298_v30 }
 0x362   : > { %v923_v59 = vmul.f32 %v3269_v35, %v920_v37  ;;  %v921_v19 = vadd.f32 -0.28449672, %v918_v18  ;;  %v1218_v60 = vsel %vm393_vm4, %v2481_v43, %v2482_v39  ;;  %v2492_v47 = vunpack.i.h.bf16 %v3265_v32 }
 0x363   : > { %v925_v20 = vmul.f32 %v3275_v41, %v922_v58  ;;  %v1201_v58 = vsel %vm374_vm5, %v2477_v52, %v2497_v26  ;;  %v2507_v16 = vunpack.i.h.bf16 %v3323_v45  ;;  %v1202_v31 = vsel %vm374_vm5, %v2497_v26, %v3289_v15 }
 0x364   : > { %v926_v49 = vadd.f32 0.2548296, %v923_v59  ;;  %v924_v38 = vmul.f32 %v3286_v54, %v921_v19  ;;  %v3383_v19 = vpop.permute.xlu1 %1263  ;;  %v889_v15 = vmul.f32 0.5, %v3239_v1  ;;  %v3406_v1 = vld [vmem:[%s3632_s4] sm:$0xf] }
 0x365   : > { %v928_v22 = vadd.f32 0.2548296, %v925_v20  ;;  %v1219_v20 = vsel %vm393_vm4, %v2482_v39, %v2502_v33 }
 0x366   : > { %v929_v61 = vmul.f32 %v3269_v35, %v926_v49  ;;  %v2603_v35 = vpop.eup %2602  ;;  %v927_v37 = vadd.f32 0.2548296, %v924_v38  ;;  %v1252_v49 = vpop.permute.xlu0 %1251  ;;  %v1238_v38 = vsel %vm412_vm6, %v2507_v16, %v1234_v21 }
 0x367   : > { %v931_v25 = vmul.f32 %v3275_v41, %v928_v22  ;;  %v2605_v59 = vpop.eup %2604  ;;  %v2491_v22 = vunpack.i.l.bf16 %v3265_v32 }
 0x368   : > { %v944_v36 = vmul.f32 %v2601_v44, %v929_v61  ;;  %v930_v11 = vmul.f32 %v3286_v54, %v927_v37  ;;  %v2512_v54 = vunpack.i.h.bf16 %v3356_v46  ;;  %v1220_v61 = vsel %vm393_vm4, %v2502_v33, %v3309_v51 }
 0x369   : > { %v946_v41 = vmul.f32 %v2603_v35, %v931_v25  ;;  %v2506_v35 = vunpack.i.l.bf16 %v3323_v45  ;;  %v1237_v51 = vsel %vm412_vm6, %v2487_v27, %v2507_v16  ;;  %v1286_v7 = vsel %vm455_vm3, %v1202_v31, %v1220_v61 }
 0x36a   : > { %v947_v34 = vsub.f32 1.0, %v944_v36  ;;  %v945_v30 = vmul.f32 %v2605_v59, %v930_v11  ;;  %v1256_v44 = vsel %vm431_vm7, %v2512_v54, %v1252_v49  ;;  %v2511_v36 = vunpack.i.l.bf16 %v3356_v46  ;;  %v1266_v33 = vpop.permute.xlu0 %1265 }
 0x36b   : > { %v949_v18 = vsub.f32 1.0, %v946_v41  ;;  %v1255_v6 = vsel %vm431_vm7, %v2492_v47, %v2512_v54  ;;  %v1290_v21 = vsel %vm455_vm3, %v1238_v38, %v1256_v44  ;;  %v1262_v41 = vpop.permute.xlu1 %1261  ;;  %v888_v27 = vmul.f32 0.5, %v3249_v9 }
 0x36c   : > { %v953_v24 = vsub.f32 0.0, %v947_v34  ;;  %v948_v39 = vsub.f32 1.0, %v945_v30  ;;  %v1217_v46 = vsel %vm393_vm4, %v2501_v23, %v2481_v43  ;;  %v1254_v59 = vsel %vm431_vm7, %v2491_v22, %v2492_v47 }
 0x36d   : > { %v955_v52 = vsub.f32 0.0, %v949_v18  ;;  %v1235_v16 = vsel %vm412_vm6, %v2506_v35, %v2486_v55  ;;  %v1284_v49 = vsel %vm455_vm3, %v1200_v57, %v1218_v60  ;;  %v2193_v9 = vpack.c.bf16 %v1290_v21, %v1286_v7 }
 0x36e   : > { %v956_v25 = vsel %vm950_vm12, %v953_v24, %v947_v34  ;;  %v954_v37 = vsub.f32 0.0, %v948_v39  ;;  %v1285_v24 = vsel %vm455_vm3, %v1201_v58, %v1219_v20  ;;  %v1289_v43 = vsel %vm455_vm3, %v1237_v51, %v1255_v6  ;;  %v1268_v57 = vpop.permute.xlu0 %1267 }
 0x36f   : > { %v958_v32 = vsel %vm952_vm13, %v955_v52, %v949_v18  ;;  %v959_v34 = vadd.f32 1.0, %v956_v25  ;;  %v887_v18 = vmul.f32 0.5, %v3237_v4  ;;  %v1270_v23 = vpop.permute.xlu1 %1269  ;;  %v1253_v4 = vsel %vm431_vm7, %v2511_v36, %v2491_v22 }
 0x370   : > { %v961_v26 = vadd.f32 1.0, %v958_v32  ;;  %v957_v11 = vsel %vm951_vm14, %v954_v37, %v948_v39  ;;  %v1288_v29 = vsel %vm455_vm3, %v3371_v10, %v1254_v59  ;;  %v2181_v55 = vpack.c.bf16 %v3334_v50, %v3327_v14 }
 0x371   : > { %v960_v17 = vadd.f32 1.0, %v957_v11  ;;  %v962_v47 = vmul.f32 %v959_v34, %v887_v18  ;;  %v2195_v58 = vpack.c.bf16 %v1289_v43, %v1285_v24  ;;  %v1274_v60 = vsel %vm450_vm8, %v1268_v57, %v1270_v23 }
 0x372   : > { %v964_v45 = vmul.f32 %v961_v26, %v889_v15  ;;  %v2185_v42 = vpack.c.bf16 %v1288_v29, %v1284_v49  ;;  %v1283_v8 = vsel %vm455_vm3, %v3374_v13, %v1217_v46  ;;  %v1273_v50 = vsel %vm450_vm8, %v1266_v33, %v1268_v57 }
 0x373   : > { %v963_v30 = vmul.f32 %v960_v17, %v888_v27  ;;  %v2763_v10 = vmov 0  }
 0x374   : > { %2107 = vmatpush3.msra.mxu1 %v964_v45  ;;  %2583 = vset.pattern.permute.xlu0 %v2763_v10 }
 0x375   : > { %2190 = vmatprep.subr.bf16.mxu1 %v2189_v28  ;;  %2109 = vmatmul.mubr.msk.f32.vlgmr.msra.gmra.mrb[4].mxu1 %vm970_vm15, %v3406_v1  ;;  %v2183_v28 = vpack.c.bf16 %v3363_v40, %v3360_v48  ;;  %v1272_v48 = vsel %vm450_vm8, %v3383_v19, %v1266_v33  ;;  %v1271_v40 = vsel %vm450_vm8, %v1262_v41, %v3383_v19 }
 0x376   : > { %2192 = vmatpush1.bf16.msra.mxu1 %v2191_v0  ;;  %1434 = vmatprep.mubr.f32.mxu1 %v2759_v12  ;;  %v1287_v0 = vsel %vm455_vm3, %v1235_v16, %v1253_v4 }
 0x377   : > { %974 = vmatprep.subr.mxu0 %v963_v30  ;;  %2194 = vmatprep.subr.bf16.mxu1 %v2193_v9  ;;  %v2187_v14 = vpack.c.bf16 %v1287_v0, %v1283_v8 }
 0x378   : > { %975 = vmatpush1.msra.mxu0 %v962_v47 }
 0x379   : > { %2039 = vmatmul.mubr.msk.f32.vlgmr.msra.gmra.mrb[4].mxu0 %vm970_vm15, %v3406_v1  ;;  %2182 = vmatprep.subr.bf16.mxu0 %v2181_v55 }
 0x37a   : > { %2184 = vmatpush1.bf16.msra.mxu0 %v2183_v28  ;;  %2196 = vmatpush1.bf16.msra.mxu1 %v2195_v58 }
 0x37b   : > { %2186 = vmatprep.subr.bf16.mxu0 %v2185_v42  ;;  %2047 = vmatprep.subr.msk.mxu1 %vm455_vm3, %v1274_v60 }
 0x37c   : > { %1363 = vmatprep.mubr.f32.mxu0 %v2759_v12 }
 0x37e   : > { %2188 = vmatpush1.bf16.msra.mxu0 %v2187_v14  ;;  %2048 = vmatpush1.msk.msra.mxu1 %vm455_vm3, %v1273_v50 }
 0x37f   : > { %2044 = vmatprep.subr.msk.mxu0 %vm455_vm3, %v1272_v48  ;;  %2049 = vmatmul.mubr.msk.f32.vlgmr.msra.gmra.mrb[6].mxu1 %vm472_vm9, %v3066_v56 }
 0x380   : > { %2213 = vmatprep.subr.bf16.mxu1 %v2761_v3  ;;  %2129 = vmatprep.mubr.msk.f32.mxu1 %vm2762_vm10, %v2759_v12 }
 0x382   : > { %2045 = vmatpush1.msk.msra.mxu0 %vm455_vm3, %v1271_v40 }
 0x383   : > { %2046 = vmatmul.mubr.msk.f32.vlgmr.msra.gmra.mrb[6].mxu0 %vm472_vm9, %v3066_v56 }
 0x384   : > { %1621 = vmatprep.mubr.f32.mxu0 %v2759_v12 }
 0x448   : > { %v3455_v13 = vpop.f32.mrb[4].mxu1 }
 0x449   : > { %v2110_v20 = vpop.f32.mrb[5].mxu1 }
 0x44c   : > { %v3457_v22 = vpop.f32.mrb[4].mxu0 }
 0x44d   : > { %v3459_v54 = vpop.f32.mrb[5].mxu0 }
 0x452   : > { %v1436_v52 = vpop.f32.mrb[6].mxu1 }
 0x453   : > { %v1438_v31 = vpop.f32.mrb[7].mxu1  ;;  %v1437_v25 = vadd.f32 %v1436_v52, %v3083_v2 }
 0x454   : > { %v1439_v19 = vadd.f32 %v1438_v31, %v3089_v5 }
 0x456   : > { %v1365_v61 = vpop.f32.mrb[6].mxu0 }
 0x457   : > { %v3463_v38 = vadd.f32 %v1365_v61, %v3081_v63  ;;  %v1367_v56 = vpop.f32.mrb[7].mxu0 }
 0x458   : > { %v1368_v44 = vadd.f32 %v1367_v56, %v3079_v62  ;;  %v293_v62 = vld [vmem:[%s3633_s5] sm:$0xf] }
 0x459   : > { %v2518_v39 = vpack.i.bf16 %v1439_v19, %v3463_v38 }
 0x45a   : > { %v2543_v63 = vpack.i.bf16 %v1437_v25, %v1368_v44 }
 0x45b   : > { %2519 = vrot.lane.b32.xlu0 %v2518_v39, %s2754_s16  ;;  %2514 = vrot.lane.b32.xlu1 %v2518_v39, %s2753_s11 }
 0x45f   : > { %2529 = vrot.lane.b32.xlu0 %v2518_v39, %s2755_s28  ;;  %2524 = vrot.lane.b32.xlu1 %v2518_v39, %s2752_s8 }
 0x463   : > { %2539 = vrot.lane.b32.xlu0 %v2518_v39, %s2756_s7  ;;  %2534 = vrot.lane.b32.xlu1 %v2518_v39, %s2757_s14 }
 0x467   : > { %2544 = vrot.lane.b32.xlu0 %v2543_v63, %s2753_s11  ;;  %2554 = vrot.lane.b32.xlu1 %v2543_v63, %s2752_s8 }
 0x46b   : > { %2549 = vrot.lane.b32.xlu0 %v2543_v63, %s2754_s16  ;;  %2564 = vrot.lane.b32.xlu1 %v2543_v63, %s2757_s14  ;;  %s2228_s16 = smul.u32 24, %s2938_s19 }
 0x46f   : > { %2559 = vrot.lane.b32.xlu0 %v2543_v63, %s2755_s28  ;;  %2574 = vrot.lane.b32.xlu1 %v2543_v63, %s2758_s29  ;;  %s3540_s28 = scalar_lea.vmem [#allocation7], %s2228_s16 }
 0x470   : > { %s1939_s14 = sshll.u32 %s3540_s28, 4  ;;  %s3578_s14 = int_to_ptr.vmem [resolvable:$true] %s1939_s14 }
 0x471   : > { %s2676_s18 = scalar_lea.vmem %s3578_s14, 384  ;;  %p2683_p5 = scmp.lt.s32.totalorder %s3578_s14, %s2681_s20 }
 0x472   : > { %p2677_p9 = scmp.ne.s32.totalorder %s3578_s14, %s2676_s18  ;;  %p2684_p0 = scmp.lt.s32.totalorder %s2682_s26, %s2676_s18 }
 0x473   : > { %2569 = vrot.lane.b32.xlu0 %v2543_v63, %s2756_s7  ;;  %2579 = vrot.lane.b32.xlu1 %v2518_v39, %s2758_s29  ;;  %s2229_s7 = smul.u32 384, %s2823_s25  ;;  %s1925_s25 = scalar_lea.sflag [#allocation4], %s2938_s19 }
 0x474   : > { %p2678_p2 = pnand %p2677_p9, %p3653_p10  ;;  %p2685_p6 = por %p2684_p0, %p2683_p5 }
 0x475   : > { %s3583_s13 = scalar_lea.hbm %s3634_s6, %s2229_s7 }
 0x476   : > { %p2679_p4 = pneg %p2678_p2 }
 0x477   : > { %1545 = vrot.lane.b32.xlu0 %v1368_v44, %s2760_s12  ;;  %1547 = vrot.lane.b32.xlu1 %v1437_v25, %s2760_s12 }
 0x478   : > { %p2686_p13 = pnand %p2685_p6, %p2679_p4 }
 0x47b   : > { %1543 = vrot.lane.b32.xlu0 %v3463_v38, %s2760_s12  ;;  %1549 = vrot.lane.b32.xlu1 %v1439_v19, %s2760_s12 }
 0x47f   : > { %967 = vperm.xlu0 %2583, %v293_v62  }
 0x4cd   : > { %v2520_v2 = vpop.permute.xlu0 %2519  ;;  %v2515_v5 = vpop.permute.xlu1 %2514 }
 0x4ce   : > { %v2517_v51 = vunpack.i.h.bf16 %v2515_v5  ;;  %v2516_v6 = vunpack.i.l.bf16 %v2515_v5  ;;  %v2522_v33 = vunpack.i.h.bf16 %v2520_v2  ;;  %v2521_v41 = vunpack.i.l.bf16 %v2520_v2 }
 0x4d1   : > { %v2530_v32 = vpop.permute.xlu0 %2529  ;;  %v2525_v35 = vpop.permute.xlu1 %2524 }
 0x4d2   : > { %v2532_v34 = vunpack.i.h.bf16 %v2530_v32  ;;  %v2531_v45 = vunpack.i.l.bf16 %v2530_v32  ;;  %v2527_v11 = vunpack.i.h.bf16 %v2525_v35  ;;  %v2526_v59 = vunpack.i.l.bf16 %v2525_v35 }
 0x4d5   : > { %v3490_v36 = vpop.permute.xlu0 %2539  ;;  %v2535_v15 = vpop.permute.xlu1 %2534 }
 0x4d6   : > { %v2542_v9 = vunpack.i.h.bf16 %v3490_v36  ;;  %v2541_v4 = vunpack.i.l.bf16 %v3490_v36  ;;  %v2537_v28 = vunpack.i.h.bf16 %v2535_v15  ;;  %v2536_v8 = vunpack.i.l.bf16 %v2535_v15 }
 0x4d9   : > { %v2545_v26 = vpop.permute.xlu0 %2544  ;;  %v2555_v37 = vpop.permute.xlu1 %2554 }
 0x4da   : > { %v2547_v7 = vunpack.i.h.bf16 %v2545_v26  ;;  %v2546_v21 = vunpack.i.l.bf16 %v2545_v26  ;;  %v2557_v46 = vunpack.i.h.bf16 %v2555_v37  ;;  %v2556_v16 = vunpack.i.l.bf16 %v2555_v37 }
 0x4dc   : > { %v1453_v27 = vsel %vm317_vm0, %v2516_v6, %v2546_v21  ;;  %v1455_v17 = vsel %vm317_vm0, %v2547_v7, %v2517_v51  ;;  %v1454_v30 = vsel %vm317_vm0, %v2546_v21, %v2547_v7  ;;  %v1483_v58 = vsel %vm355_vm2, %v2557_v46, %v2527_v11 }
 0x4dd   : > { %v2214_v18 = vpack.c.bf16 %v1455_v17, %v1437_v25  ;;  %v2550_v49 = vpop.permute.xlu0 %2549  ;;  %v2565_v24 = vpop.permute.xlu1 %2564  ;;  %v2199_v43 = vpack.c.bf16 %v1453_v27, %v3463_v38  ;;  %v2197_v57 = vpack.c.bf16 %v1454_v30, %v1368_v44  ;;  %v1481_v0 = vsel %vm355_vm2, %v2526_v59, %v2556_v16 }
 0x4de   : > { %v2552_v23 = vunpack.i.h.bf16 %v2550_v49  ;;  %v2551_v47 = vunpack.i.l.bf16 %v2550_v49  ;;  %v2567_v29 = vunpack.i.h.bf16 %v2565_v24  ;;  %v2566_v55 = vunpack.i.l.bf16 %v2565_v24 }
 0x4df   : > { %2215 = vmatpush3.bf16.msra.mxu1 %v2214_v18  ;;  %2198 = vmatprep.subr.bf16.mxu0 %v2197_v57  ;;  %v1482_v31 = vsel %vm355_vm2, %v2556_v16, %v2557_v46 }
 0x4e0   : > { %v1467_v60 = vsel %vm336_vm1, %v2521_v41, %v2551_v47  ;;  %v1469_v42 = vsel %vm336_vm1, %v2552_v23, %v2522_v33  ;;  %2216 = vmatprep.subr.bf16.mxu1 %v2761_v3  ;;  %v1468_v40 = vsel %vm336_vm1, %v2551_v47, %v2552_v23  ;;  %2200 = vmatpush1.bf16.msra.mxu0 %v2199_v43 }
 0x4e1   : > { %v2217_v14 = vpack.c.bf16 %v1483_v58, %v1469_v42  ;;  %v2560_v50 = vpop.permute.xlu0 %2559  ;;  %v2575_v48 = vpop.permute.xlu1 %2574  ;;  %v2203_v10 = vpack.c.bf16 %v1481_v0, %v1467_v60  ;;  %v1509_v19 = vsel %vm393_vm4, %v2536_v8, %v2566_v55  ;;  %v1511_v61 = vsel %vm393_vm4, %v2567_v29, %v2537_v28 }
 0x4e2   : > { %v2562_v20 = vunpack.i.h.bf16 %v2560_v50  ;;  %v2561_v52 = vunpack.i.l.bf16 %v2560_v50  ;;  %v2201_v38 = vpack.c.bf16 %v1482_v31, %v1468_v40  ;;  %v1510_v56 = vsel %vm393_vm4, %v2566_v55, %v2567_v29 }
 0x4e3   : > { %2218 = vmatpush3.bf16.msra.mxu1 %v2217_v14  ;;  %v2577_v25 = vunpack.i.h.bf16 %v2575_v48  ;;  %v2576_v5 = vunpack.i.l.bf16 %v2575_v48 }
 0x4e4   : > { %v1495_v39 = vsel %vm374_vm5, %v2531_v45, %v2561_v52  ;;  %v1497_v44 = vsel %vm374_vm5, %v2562_v20, %v2532_v34  ;;  %2219 = vmatprep.subr.bf16.mxu1 %v2761_v3  ;;  %v1496_v63 = vsel %vm374_vm5, %v2561_v52, %v2562_v20  ;;  %2202 = vmatprep.subr.bf16.mxu0 %v2201_v38 }
 0x4e5   : > { %v2207_v62 = vpack.c.bf16 %v1509_v19, %v1495_v39  ;;  %v2220_v2 = vpack.c.bf16 %v1511_v61, %v1497_v44  ;;  %v2570_v32 = vpop.permute.xlu0 %2569  ;;  %v2580_v35 = vpop.permute.xlu1 %2579  ;;  %v2205_v36 = vpack.c.bf16 %v1510_v56, %v1496_v63  ;;  %2204 = vmatpush1.bf16.msra.mxu0 %v2203_v10  ;;  %v1538_v27 = vsel %vm431_vm7, %v2576_v5, %v2577_v25 }
 0x4e6   : > { %v2572_v15 = vunpack.i.h.bf16 %v2570_v32  ;;  %v2571_v26 = vunpack.i.l.bf16 %v2570_v32  ;;  %v2582_v37 = vunpack.i.h.bf16 %v2580_v35  ;;  %v2581_v51 = vunpack.i.l.bf16 %v2580_v35 }
 0x4e7   : > { %2206 = vmatprep.subr.bf16.mxu0 %v2205_v36  ;;  %2221 = vmatpush3.bf16.msra.mxu1 %v2220_v2 }
 0x4e8   : > { %v1523_v6 = vsel %vm412_vm6, %v2541_v4, %v2571_v26  ;;  %v1525_v7 = vsel %vm412_vm6, %v2572_v15, %v2542_v9  ;;  %v1537_v21 = vsel %vm431_vm7, %v2581_v51, %v2576_v5  ;;  %v1539_v33 = vsel %vm431_vm7, %v2577_v25, %v2582_v37  ;;  %2222 = vmatprep.subr.bf16.mxu1 %v2761_v3 }
 0x4e9   : > { %v2223_v41 = vpack.c.bf16 %v1539_v33, %v1525_v7  ;;  %v1546_v34 = vpop.permute.xlu0 %1545  ;;  %v1548_v45 = vpop.permute.xlu1 %1547  ;;  %v1524_v11 = vsel %vm412_vm6, %v2571_v26, %v2572_v15  ;;  %v2211_v17 = vpack.c.bf16 %v1537_v21, %v1523_v6  ;;  %2208 = vmatpush1.bf16.msra.mxu0 %v2207_v62 }
 0x4ea   : > { %v2209_v46 = vpack.c.bf16 %v1538_v27, %v1524_v11  ;;  %v1552_v16 = vsel %vm450_vm8, %v1546_v34, %v1548_v45 }
 0x4eb   : > { %2224 = vmatpush3.bf16.msra.mxu1 %v2223_v41 }
 0x4ec   : > { %2210 = vmatprep.subr.bf16.mxu0 %v2209_v46  ;;  %2127 = vmatprep.subr.mxu1 %v2759_v12 }
 0x4ed   : > { %v1544_v59 = vpop.permute.xlu0 %1543  ;;  %v1550_v18 = vpop.permute.xlu1 %1549  ;;  %2212 = vmatpush1.bf16.msra.mxu0 %v2211_v17 }
 0x4ee   : > { %v1553_v3 = vsel %vm450_vm8, %v1548_v45, %v1550_v18  ;;  %v1551_v49 = vsel %vm450_vm8, %v1544_v59, %v1546_v34  ;;  %1573 = vmatprep.subr.mxu0 %v1552_v16 }
 0x4ef   : > { %2128 = vmatpush3.msra.mxu1 %v1553_v3 }
 0x4f0   : > { %2130 = vmatmul.mubr.msk.f32.vlgmr.msra.gmra.mrb[8].mxu1 %vm742_vm11, %v3212_v53  ;;  %2132 = vmatprep.subr.mxu1 %v2759_v12 }
 0x4f1   : > { %2134 = vmatprep.mubr.msk.f32.mxu1 %vm2762_vm10, %v2759_v12  ;;  %1574 = vmatpush1.msra.mxu0 %v1551_v49 }
 0x4f2   : > { %2050 = vmatmul.mubr.msk.f32.vlgmr.msra.gmra.mrb[8].mxu0 %vm742_vm11, %v3212_v53 }
 0x4f3   : > { %1840 = vmatprep.mubr.f32.mxu0 %v2759_v12 }
 0x4fe   : > { %v3532_v24 = vpop.permute.xlu0 %967 }
 0x4ff   : > { %v1041_v30 = vadd.f32 %v3457_v22, %v3532_v24  ;;  %v1043_v9 = vadd.f32 %v3459_v54, %v3532_v24  ;;  %v1112_v43 = vadd.f32 %v3455_v13, %v3532_v24 }
 0x501   : > { %v1117_v23 = vcombine.low %v1041_v30, %v1043_v9  ;;  %1120 = vst [vmem:[%s3540_s28 + $0x8] sm:$0xf] %v1112_v43 }
 0x503   : > { %1119 = vst [vmem:[%s3540_s28] sm:$0xff] %v1117_v23 }
 0x5c3   : > { %v3544_v12 = vpop.f32.mrb[8].mxu1 }
 0x5c4   : > { %v3547_v53 = vmul.f32 0.70710677, %v3544_v12  ;;  %v2131_v47 = vpop.f32.mrb[9].mxu1 }
 0x5c5   : > { %v3550_v4 = vpop.f32.mrb[8].mxu0 }
 0x5c6   : > { %v1706_v22 = vand.u32 2147483647, %v3547_v53  ;;  %v3553_v54 = vmul.f32 0.70710677, %v3550_v4  ;;  %v3555_v13 = vpop.f32.mrb[9].mxu0  ;;  %vm1763_vm0 = vcmp.lt.f32.partialorder %v3547_v53, 0.0 }
 0x5c7   : > { %v3558_v55 = vmul.f32 0.70710677, %v3555_v13  ;;  %v1699_v53 = vmul.f32 0.5, %v3555_v13 }
 0x5c8   : > { %v1709_v29 = vmul.f32 0.3275911, %v1706_v22  ;;  %v1704_v57 = vand.u32 2147483647, %v3553_v54  ;;  %v1745_v14 = vsub.f32 0.0, %v1706_v22  ;;  %vm1761_vm1 = vcmp.lt.f32.partialorder %v3553_v54, 0.0 }
 0x5c9   : > { %v1705_v58 = vand.u32 2147483647, %v3558_v55  ;;  %vm1762_vm2 = vcmp.lt.f32.partialorder %v3558_v55, 0.0 }
 0x5ca   : > { %v1712_v28 = vadd.f32 1.0, %v1709_v29  ;;  %v1707_v60 = vmul.f32 0.3275911, %v1704_v57  ;;  %v1743_v50 = vsub.f32 0.0, %v1704_v57  ;;  %v1748_v40 = vmul.f32 %v1745_v14, %v1706_v22 }
 0x5cb   : > { %v1708_v42 = vmul.f32 0.3275911, %v1705_v58  ;;  %v1744_v10 = vsub.f32 0.0, %v1705_v58 }
 0x5cc   : > { %2606 = vrcp.f32 %v1712_v28  ;;  %v1710_v8 = vadd.f32 1.0, %v1707_v60  ;;  %v1746_v19 = vmul.f32 %v1743_v50, %v1704_v57  ;;  %v1753_v38 = vmul.f32 1.442695, %v1748_v40 }
 0x5cd   : > { %v1711_v0 = vadd.f32 1.0, %v1708_v42  ;;  %v1747_v39 = vmul.f32 %v1744_v10, %v1705_v58  ;;  %v1700_v28 = vmul.f32 0.5, %v3544_v12  ;;  %v1698_v12 = vmul.f32 0.5, %v3550_v4 }
 0x5ce   : > { %2608 = vrcp.f32 %v1710_v8  ;;  %v1749_v2 = vmul.f32 1.442695, %v1746_v19 }
 0x5cf   : > { %2610 = vrcp.f32 %v1711_v0  ;;  %v1751_v35 = vmul.f32 1.442695, %v1747_v39 }
 0x5d0   : > { %2612 = vpow2.f32 %v1753_v38 }
 0x5d1   : > { %2614 = vpow2.f32 %v1749_v2 }
 0x5d2   : > { %2616 = vpow2.f32 %v1751_v35 }
 0x5d6   : > { %v2607_v48 = vpop.eup %2606 }
 0x5d7   : > { %v1718_v20 = vmul.f32 1.0614054, %v2607_v48 }
 0x5d8   : > { %v2609_v52 = vpop.eup %2608 }
 0x5d9   : > { %v1721_v31 = vadd.f32 -1.4531521, %v1718_v20  ;;  %v2611_v61 = vpop.eup %2610  ;;  %v1716_v56 = vmul.f32 1.0614054, %v2609_v52 }
 0x5da   : > { %v1717_v25 = vmul.f32 1.0614054, %v2611_v61  ;;  %v2613_v17 = vpop.eup %2612 }
 0x5db   : > { %v1724_v44 = vmul.f32 %v2607_v48, %v1721_v31  ;;  %v1719_v63 = vadd.f32 -1.4531521, %v1716_v56  ;;  %v2615_v16 = vpop.eup %2614 }
 0x5dc   : > { %v1720_v5 = vadd.f32 -1.4531521, %v1717_v25  ;;  %v2617_v9 = vpop.eup %2616 }
 0x5dd   : > { %v1727_v62 = vadd.f32 1.4214138, %v1724_v44  ;;  %v1722_v32 = vmul.f32 %v2609_v52, %v1719_v63 }
 0x5de   : > { %v1723_v15 = vmul.f32 %v2611_v61, %v1720_v5 }
 0x5df   : > { %v1730_v36 = vmul.f32 %v2607_v48, %v1727_v62  ;;  %v1725_v26 = vadd.f32 1.4214138, %v1722_v32 }
 0x5e0   : > { %v1726_v51 = vadd.f32 1.4214138, %v1723_v15 }
 0x5e1   : > { %v1733_v37 = vadd.f32 -0.28449672, %v1730_v36  ;;  %v1728_v6 = vmul.f32 %v2609_v52, %v1725_v26 }
 0x5e2   : > { %v1729_v21 = vmul.f32 %v2611_v61, %v1726_v51 }
 0x5e3   : > { %v1736_v7 = vmul.f32 %v2607_v48, %v1733_v37  ;;  %v1731_v33 = vadd.f32 -0.28449672, %v1728_v6 }
 0x5e4   : > { %v1732_v34 = vadd.f32 -0.28449672, %v1729_v21 }
 0x5e5   : > { %v1739_v41 = vadd.f32 0.2548296, %v1736_v7  ;;  %v1734_v45 = vmul.f32 %v2609_v52, %v1731_v33 }
 0x5e6   : > { %v1735_v27 = vmul.f32 %v2611_v61, %v1732_v34 }
 0x5e7   : > { %v1742_v11 = vmul.f32 %v2607_v48, %v1739_v41  ;;  %v1737_v46 = vadd.f32 0.2548296, %v1734_v45 }
 0x5e8   : > { %v1738_v18 = vadd.f32 0.2548296, %v1735_v27 }
 0x5e9   : > { %v1757_v59 = vmul.f32 %v2613_v17, %v1742_v11  ;;  %v1740_v3 = vmul.f32 %v2609_v52, %v1737_v46 }
 0x5ea   : > { %v1741_v30 = vmul.f32 %v2611_v61, %v1738_v18 }
 0x5eb   : > { %v1760_v49 = vsub.f32 1.0, %v1757_v59  ;;  %v1755_v43 = vmul.f32 %v2615_v16, %v1740_v3 }
 0x5ec   : > { %v1756_v47 = vmul.f32 %v2617_v9, %v1741_v30 }
 0x5ed   : > { %v1766_v23 = vsub.f32 0.0, %v1760_v49  ;;  %v1758_v22 = vsub.f32 1.0, %v1755_v43 }
 0x5ee   : > { %v1759_v57 = vsub.f32 1.0, %v1756_v47 }
 0x5ef   : > { %v1769_v29 = vsel %vm1763_vm0, %v1766_v23, %v1760_v49  ;;  %v1764_v60 = vsub.f32 0.0, %v1758_v22 }
 0x5f0   : > { %v1772_v58 = vadd.f32 1.0, %v1769_v29  ;;  %v1765_v42 = vsub.f32 0.0, %v1759_v57 }
 0x5f1   : > { %v1767_v0 = vsel %vm1761_vm1, %v1764_v60, %v1758_v22 }
 0x5f2   : > { %v1775_v8 = vmul.f32 %v1772_v58, %v1700_v28  ;;  %v1770_v14 = vadd.f32 1.0, %v1767_v0  ;;  %v1768_v50 = vsel %vm1762_vm2, %v1765_v42, %v1759_v57 }
 0x5f3   : > { %v1771_v48 = vadd.f32 1.0, %v1768_v50 }
 0x5f4   : > { %2133 = vmatpush3.msra.mxu1 %v1775_v8  ;;  %v1773_v40 = vmul.f32 %v1770_v14, %v1698_v12 }
 0x5f5   : > { %2135 = vmatmul.mubr.msk.f32.vlgmr.msra.gmra.mrb[10].mxu1 %vm970_vm15, %v3406_v1  ;;  %v1774_v54 = vmul.f32 %v1771_v48, %v1699_v53 }
 0x5f7   : > { %1776 = vmatprep.subr.mxu0 %v1774_v54 }
 0x5f8   : > { %1777 = vmatpush1.msra.mxu0 %v1773_v40 }
 0x5f9   : > { %2052 = vmatmul.mubr.msk.f32.vlgmr.msra.gmra.mrb[10].mxu0 %vm970_vm15, %v3406_v1 }
 0x6c8   : > { %v1913_v55 = vpop.f32.mrb[10].mxu1 }
 0x6c9   : > { %v1914_v13 = vadd.f32 %v1913_v55, %v3532_v24  ;;  %v2136_v10 = vpop.f32.mrb[11].mxu1 }
 0x6cb   : > { %2055 = vst [vmem:[%s3540_s28 + $0x14] sm:$0xf] %v1914_v13 }
 0x6cc   : > { %v1842_v4 = vpop.f32.mrb[10].mxu0 }
 0x6cd   : > { %v1843_v20 = vadd.f32 %v1842_v4, %v3532_v24  ;;  %v1844_v52 = vpop.f32.mrb[11].mxu0 }
 0x6ce   : > { %v1845_v31 = vadd.f32 %v1844_v52, %v3532_v24 }
 0x6d0   : > { %v1919_v1 = vcombine.low %v1843_v20, %v1845_v31 }
 0x6d2   : > { %2054 = vst [vmem:[%s3540_s28 + $0xc] sm:$0xff] %v1919_v1 }
 0x6d3   : > { %2689 = shalt.err (!%p2686_p13)
}
 0x6d4   : > { %s2690_s15 = scalar_lea.hbm %s3583_s13, 384  ;;  %s2694_s16 = scalar_lea.hbm %s3634_s6, 768 }
 0x6d5   : > { %p2691_p7 = scmp.ne.s32.totalorder %s3583_s13, %s2690_s15  ;;  %p2695_p1 = scmp.lt.u32.totalorder %s3583_s13, %s3634_s6 }
 0x6d6   : > { %p2696_p11 = scmp.lt.u32.totalorder %s2694_s16, %s2690_s15  ;;  %p2698_p9 = scmp.lt.u32.totalorder %s2690_s15, %s3583_s13 }
 0x6d7   : > { %p2692_p3 = pnand %p2691_p7, %p3653_p10 }
 0x6d8   : > { %p2697_p8 = por %p2696_p11, %p2695_p1 }
 0x6d9   : > { %p2693_p12 = pneg %p2692_p3 }
 0x6da   : > { %p2699_p2 = por %p2698_p9, %p2697_p8 }
 0x6dc   : > { %p2700_p4 = pnand %p2699_p2, %p2693_p12 }
 0x6de   : > { %2703 = shalt.err (!%p2700_p4)
}
 0x6df   : > { %s2765_s29 = smov 192   ;;  %s2766_s12 = smov 12  }
 0x6e0   : > { %2236 = dma.vmem_to_hbm [thread:$0]  (%p3653_p10), %s3578_s14, 384, %s3583_s13, %s1925_s25, %s2765_s29, %s2765_s29, %s2766_s12  }
 0x6e1 PF: > { %s1954_s18 = sand.u32 1, %s2734_s21   ;;  %p3654_p5 = scmp.ne.s32.totalorder %s3643_s10, 0 }
 0x6e2   : > { %p3655_p0 = scmp.ge.s32.totalorder %s2746_s24, 2  ;;  %s1955_s17 = scalar_lea.sflag [#allocation4], %s1954_s18 }
 0x6e4   : > { %p2247_p6 = pnand %p3655_p0, %p3654_p5 }
 0x6e6   : > { %2729 = dma.done.wait (!%p2247_p6), %s1955_s17, 384  }
 0x6e7   : > { %2731 = vsyncadd (!%p2247_p6), %s1955_s17, 4294966912  ;;  %p20_p13 = scmp.ge.s32.totalorder %s2827_s27, 4   ;;  %s3656_s21 = smov %s2738_s22 }
 0x6e8   : > { %s3657_s22 = smov %s2742_s23  ;;  %s3658_s23 = smov %s2839_s30 }
 0x6e9   : > { %s3659_s24 = smov %s2827_s27  ;;  %22 = sbr.rel (!%p20_p13) target bundleno = 6 (0x6), region = 95 }
 0x6f0   :  { %1960 = vsyncpa [#allocation3], 1 }
 0x6f1   :  { %1962 = vsyncpa [#allocation3 + $0x1], 1 }
 0x6f2   :  { %1963 = vsyncpa [#allocation6], 1 }
 0x6f3   :  { %1964 = vsyncpa [#allocation4], 1 }
 0x6f4   :  { %1966 = vsyncpa [#allocation4 + $0x1], 1 }

</bundles_post_ra>
